<compile_context>
chip_gen: v7x
topology: tpu7x:2x2x1
jax: 0.10.0
libtpu: 0.0.40
codegen_flags: <defaults>
</compile_context>

<pallas_src>
import jax
import jax.numpy as jnp
from jax.experimental import pallas as pl
from jax.experimental.pallas import tpu as pltpu

C1_OUT, C2_OUT, K1, K2 = 20, 12, 5, 3
H_IN = 14
H1 = (H_IN - K1) // 2 + 1        # 5   conv1 output spatial
H2 = H1 - K2 + 1                 # 3   conv2 output spatial
FEAT = C2_OUT * H2 * H2          # 108 flattened features into the linear layer
N_CLASSES = 10
OUT_PAD = 128                    # lane-dense logits block (sliced to 10 outside)
TILE_N_MAX = 256                 # per-tile batch; working set << 16 MiB scoped VMEM


def _round_up(a, b):
    return (a + b - 1) // b * b


def mycnn_kernel(p1_ref, w1_ref, w2_ref, wl_ref, bl_ref, out_ref):
    """One batch tile of T samples.

    p1_ref : (25*T, 25)   bf16  conv1 im2col, row = p*T + t (p = conv1 spatial pos)
    w1_ref : (25, 20)     bf16
    w2_ref : (180, 12)    bf16  row = (kh*3+kw)*20 + ci
    wl_ref : (108, 128)   bf16  row = (oh*3+ow)*12 + c ; cols >= 10 are zero
    bl_ref : (1, 128)     f32   bias padded with zeros
    out_ref: (T, 128)     f32
    """
    tn = out_ref.shape[0]

    # ---- conv1: single MXU matmul for the whole tile, ReLU in f32.
    h1 = jnp.dot(p1_ref[...], w1_ref[...], preferred_element_type=jnp.float32)
    h1 = jnp.maximum(h1, 0.0)                                     # (25*T, 20)

    # ---- conv2: im2col of h1 via static slices (rows are spatial-major, so
    # each shifted block is a contiguous, sublane-aligned slice).  The 9
    # offsets are concatenated along lanes -> one fused K=180 matmul.
    pos_rows = []
    for oh in range(H2):
        for ow in range(H2):
            offs = []
            for kh in range(K2):
                for kw in range(K2):
                    p = (oh + kh) * H1 + (ow + kw)
                    offs.append(h1[p * tn:(p + 1) * tn, :])       # (T, 20)
            pos_rows.append(jnp.concatenate(offs, axis=-1))       # (T, 180)
    cat = jnp.concatenate(pos_rows, axis=0).astype(jnp.bfloat16)  # (9*T, 180)
    h2 = jnp.dot(cat, w2_ref[...], preferred_element_type=jnp.float32)  # (9*T, 12)

    # ---- linear: flatten the 9 spatial positions along lanes -> (T, 108),
    # single K=108 matmul against the (lane-padded) linear weight, add bias.
    feat = jnp.concatenate(
        [h2[q * tn:(q + 1) * tn, :] for q in range(H2 * H2)], axis=-1
    ).astype(jnp.bfloat16)                                        # (T, 108)
    logits = jnp.dot(feat, wl_ref[...], preferred_element_type=jnp.float32)
    out_ref[...] = logits + bl_ref[...]                           # (T, 128)


@jax.jit
def mycnn_forward(x, w1, w2, wl, bl):
    """x: (N,1,14,14); w1:(20,1,5,5); w2:(12,20,3,3); wl:(10,108); bl:(10,)."""
    n = x.shape[0]
    tn = min(_round_up(n, 16), TILE_N_MAX)        # tile batch, multiple of 16 (bf16 sublane)
    n_pad = _round_up(n, tn)
    g = n_pad // tn

    # ---- plain-XLA glue: pad batch, im2col for conv1 (stride 2, k=5),
    # feature order (kh, kw) to match w1.reshape(20, 25).
    xs = jnp.pad(x[:, 0], ((0, n_pad - n), (0, 0), (0, 0)))       # (NP, 14, 14)
    cols = [xs[:, kh:kh + 2 * H1 - 1:2, kw:kw + 2 * H1 - 1:2]     # each (NP, 5, 5)
            for kh in range(K1) for kw in range(K1)]
    p1 = jnp.stack(cols, axis=-1).reshape(n_pad, H1 * H1, K1 * K1)
    # per-tile row order (spatial p, sample t): (g,T,25,25) -> (g,25,T,25)
    p1 = p1.reshape(g, tn, H1 * H1, K1 * K1).transpose(0, 2, 1, 3)
    p1 = p1.reshape(g * H1 * H1 * tn, K1 * K1).astype(jnp.bfloat16)
    # TODO(synk): conv1 im2col could move in-kernel (strided slices of a
    # (T,14,14) block) to cut HBM bytes ~3x; kept host-side for simplicity.

    # ---- weights rearranged once (O(1) in N), cast to bf16.
    w1m = w1.reshape(C1_OUT, K1 * K1).T.astype(jnp.bfloat16)                       # (25, 20)
    w2m = jnp.transpose(w2, (2, 3, 1, 0)).reshape(K2 * K2 * C1_OUT, C2_OUT)
    w2m = w2m.astype(jnp.bfloat16)                                                 # (180, 12)
    # wl3[(oh*3+ow)*12 + c, o] = wl[o, c*9 + (oh*3+ow)]  (PyTorch NCHW flatten)
    wl3 = jnp.transpose(wl.reshape(N_CLASSES, C2_OUT, H2 * H2), (2, 1, 0))
    wl3 = wl3.reshape(FEAT, N_CLASSES)
    wl3 = jnp.pad(wl3, ((0, 0), (0, OUT_PAD - N_CLASSES))).astype(jnp.bfloat16)    # (108, 128)
    blp = jnp.pad(bl.reshape(1, N_CLASSES).astype(jnp.float32),
                  ((0, 0), (0, OUT_PAD - N_CLASSES)))                              # (1, 128)

    out = pl.pallas_call(
        mycnn_kernel,
        out_shape=jax.ShapeDtypeStruct((n_pad, OUT_PAD), jnp.float32),
        grid_spec=pltpu.PrefetchScalarGridSpec(
            num_scalar_prefetch=0,
            grid=(g,),
            in_specs=[
                pl.BlockSpec((H1 * H1 * tn, K1 * K1), lambda i: (i, 0)),
                pl.BlockSpec((K1 * K1, C1_OUT), lambda i: (0, 0)),
                pl.BlockSpec((K2 * K2 * C1_OUT, C2_OUT), lambda i: (0, 0)),
                pl.BlockSpec((FEAT, OUT_PAD), lambda i: (0, 0)),
                pl.BlockSpec((1, OUT_PAD), lambda i: (0, 0)),
            ],
            out_specs=pl.BlockSpec((tn, OUT_PAD), lambda i: (i, 0)),
        ),
        compiler_params=pltpu.CompilerParams(
            dimension_semantics=("parallel",),          # megacore on v7x
            vmem_limit_bytes=32 * 1024 * 1024,          # far above actual need
        ),
    )(p1, w1m, w2m, wl3, blp)
    return out[:n, :N_CLASSES]


def mycnn_reference(x, w1, w2, wl, bl):
    """Pure-JAX reference mirroring the PyTorch forward exactly (NCHW)."""
    y = jax.lax.conv_general_dilated(x, w1, (2, 2), "VALID",
                                     dimension_numbers=("NCHW", "OIHW", "NCHW"))
    y = jnp.maximum(y, 0.0)
    y = jax.lax.conv_general_dilated(y, w2, (1, 1), "VALID",
                                     dimension_numbers=("NCHW", "OIHW", "NCHW"))
    y = y.reshape(x.shape[0], -1)
    return y @ wl.T + bl


if __name__ == "__main__":
    key = jax.random.PRNGKey(0)
    kx, k1, k2, k3, k4 = jax.random.split(key, 5)
    # deterministic synthetic parameters (shapes from myCNN.__init__)
    x = jax.random.normal(kx, (2, 1, H_IN, H_IN), jnp.float32)
    w1 = jax.random.normal(k1, (C1_OUT, 1, K1, K1), jnp.float32) * 0.2
    w2 = jax.random.normal(k2, (C2_OUT, C1_OUT, K2, K2), jnp.float32) * 0.075
    wl = jax.random.normal(k3, (N_CLASSES, FEAT), jnp.float32) * 0.1
    bl = jax.random.normal(k4, (N_CLASSES,), jnp.float32) * 0.1

    out = jax.block_until_ready(mycnn_forward(x, w1, w2, wl, bl))
    ref = jax.block_until_ready(mycnn_reference(x, w1, w2, wl, bl))

    assert out.shape == (2, N_CLASSES), out.shape
    assert jnp.allclose(out, ref, atol=1e-1, rtol=5e-2), (out, ref)
    print("KERNEL_OK")
</pallas_src>

<mosaic_0001>
module attributes {stable_mosaic.version = 11 : i64} {
  func.func @mycnn_kernel(%arg0: i32, %arg1: memref<400x25xbf16, #tpu.memory_space<vmem>>, %arg2: memref<25x20xbf16, #tpu.memory_space<vmem>>, %arg3: memref<180x12xbf16, #tpu.memory_space<vmem>>, %arg4: memref<108x128xbf16, #tpu.memory_space<vmem>>, %arg5: memref<1x128xf32, #tpu.memory_space<vmem>>, %arg6: memref<16x128xf32, #tpu.memory_space<vmem>>) attributes {dimension_semantics = [#tpu.dimension_semantics<parallel>], iteration_bounds = array<i64: 1>, scalar_prefetch = 0 : i64, scratch_operands = 0 : i64, tpu.core_type = #tpu.core_type<tc>, window_params = [{transform_indices = @transform_0, window_bounds = array<i64: 400, 25>}, {pipeline_mode = #tpu.pipeline_mode<synchronous>, transform_indices = @transform_1, window_bounds = array<i64: 25, 20>}, {pipeline_mode = #tpu.pipeline_mode<synchronous>, transform_indices = @transform_2, window_bounds = array<i64: 180, 12>}, {pipeline_mode = #tpu.pipeline_mode<synchronous>, transform_indices = @transform_3, window_bounds = array<i64: 108, 128>}, {pipeline_mode = #tpu.pipeline_mode<synchronous>, transform_indices = @transform_4, window_bounds = array<i64: 1, 128>}, {transform_indices = @transform_5, window_bounds = array<i64: 16, 128>}]} {
    %c0 = arith.constant 0 : index
    %c0_0 = arith.constant 0 : index
    %0 = vector.load %arg1[%c0, %c0_0] : memref<400x25xbf16, #tpu.memory_space<vmem>>, vector<400x25xbf16>
    %c0_1 = arith.constant 0 : index
    %c0_2 = arith.constant 0 : index
    %1 = vector.load %arg2[%c0_1, %c0_2] : memref<25x20xbf16, #tpu.memory_space<vmem>>, vector<25x20xbf16>
    %cst = arith.constant dense<0.000000e+00> : vector<400x20xf32>
    %2 = tpu.matmul %0, %1, %cst {dimension_numbers = #tpu.dot_dimension_numbers<[1], [0], [0], [1], [0, 0, 1, 1], [], []>} : vector<400x25xbf16>, vector<25x20xbf16>, vector<400x20xf32> -> vector<400x20xf32>
    %cst_3 = arith.constant 0.000000e+00 : f32
    %3 = vector.broadcast %cst_3 : f32 to vector<400x20xf32>
    %4 = arith.maximumf %2, %3 : vector<400x20xf32>
    %5 = vector.extract_strided_slice %4 {offsets = [0, 0], sizes = [16, 20], strides = [1, 1]} : vector<400x20xf32> to vector<16x20xf32>
    %6 = vector.extract_strided_slice %4 {offsets = [16, 0], sizes = [16, 20], strides = [1, 1]} : vector<400x20xf32> to vector<16x20xf32>
    %7 = vector.extract_strided_slice %4 {offsets = [32, 0], sizes = [16, 20], strides = [1, 1]} : vector<400x20xf32> to vector<16x20xf32>
    %8 = vector.extract_strided_slice %4 {offsets = [80, 0], sizes = [16, 20], strides = [1, 1]} : vector<400x20xf32> to vector<16x20xf32>
    %9 = vector.extract_strided_slice %4 {offsets = [96, 0], sizes = [16, 20], strides = [1, 1]} : vector<400x20xf32> to vector<16x20xf32>
    %10 = vector.extract_strided_slice %4 {offsets = [112, 0], sizes = [16, 20], strides = [1, 1]} : vector<400x20xf32> to vector<16x20xf32>
    %11 = vector.extract_strided_slice %4 {offsets = [160, 0], sizes = [16, 20], strides = [1, 1]} : vector<400x20xf32> to vector<16x20xf32>
    %12 = vector.extract_strided_slice %4 {offsets = [176, 0], sizes = [16, 20], strides = [1, 1]} : vector<400x20xf32> to vector<16x20xf32>
    %13 = vector.extract_strided_slice %4 {offsets = [192, 0], sizes = [16, 20], strides = [1, 1]} : vector<400x20xf32> to vector<16x20xf32>
    %14 = tpu.concatenate %5, %6, %7, %8, %9, %10, %11, %12, %13 in 1 : vector<16x20xf32>, vector<16x20xf32>, vector<16x20xf32>, vector<16x20xf32>, vector<16x20xf32>, vector<16x20xf32>, vector<16x20xf32>, vector<16x20xf32>, vector<16x20xf32> -> vector<16x180xf32>
    %15 = vector.extract_strided_slice %4 {offsets = [16, 0], sizes = [16, 20], strides = [1, 1]} : vector<400x20xf32> to vector<16x20xf32>
    %16 = vector.extract_strided_slice %4 {offsets = [32, 0], sizes = [16, 20], strides = [1, 1]} : vector<400x20xf32> to vector<16x20xf32>
    %17 = vector.extract_strided_slice %4 {offsets = [48, 0], sizes = [16, 20], strides = [1, 1]} : vector<400x20xf32> to vector<16x20xf32>
    %18 = vector.extract_strided_slice %4 {offsets = [96, 0], sizes = [16, 20], strides = [1, 1]} : vector<400x20xf32> to vector<16x20xf32>
    %19 = vector.extract_strided_slice %4 {offsets = [112, 0], sizes = [16, 20], strides = [1, 1]} : vector<400x20xf32> to vector<16x20xf32>
    %20 = vector.extract_strided_slice %4 {offsets = [128, 0], sizes = [16, 20], strides = [1, 1]} : vector<400x20xf32> to vector<16x20xf32>
    %21 = vector.extract_strided_slice %4 {offsets = [176, 0], sizes = [16, 20], strides = [1, 1]} : vector<400x20xf32> to vector<16x20xf32>
    %22 = vector.extract_strided_slice %4 {offsets = [192, 0], sizes = [16, 20], strides = [1, 1]} : vector<400x20xf32> to vector<16x20xf32>
    %23 = vector.extract_strided_slice %4 {offsets = [208, 0], sizes = [16, 20], strides = [1, 1]} : vector<400x20xf32> to vector<16x20xf32>
    %24 = tpu.concatenate %15, %16, %17, %18, %19, %20, %21, %22, %23 in 1 : vector<16x20xf32>, vector<16x20xf32>, vector<16x20xf32>, vector<16x20xf32>, vector<16x20xf32>, vector<16x20xf32>, vector<16x20xf32>, vector<16x20xf32>, vector<16x20xf32> -> vector<16x180xf32>
    %25 = vector.extract_strided_slice %4 {offsets = [32, 0], sizes = [16, 20], strides = [1, 1]} : vector<400x20xf32> to vector<16x20xf32>
    %26 = vector.extract_strided_slice %4 {offsets = [48, 0], sizes = [16, 20], strides = [1, 1]} : vector<400x20xf32> to vector<16x20xf32>
    %27 = vector.extract_strided_slice %4 {offsets = [64, 0], sizes = [16, 20], strides = [1, 1]} : vector<400x20xf32> to vector<16x20xf32>
    %28 = vector.extract_strided_slice %4 {offsets = [112, 0], sizes = [16, 20], strides = [1, 1]} : vector<400x20xf32> to vector<16x20xf32>
    %29 = vector.extract_strided_slice %4 {offsets = [128, 0], sizes = [16, 20], strides = [1, 1]} : vector<400x20xf32> to vector<16x20xf32>
    %30 = vector.extract_strided_slice %4 {offsets = [144, 0], sizes = [16, 20], strides = [1, 1]} : vector<400x20xf32> to vector<16x20xf32>
    %31 = vector.extract_strided_slice %4 {offsets = [192, 0], sizes = [16, 20], strides = [1, 1]} : vector<400x20xf32> to vector<16x20xf32>
    %32 = vector.extract_strided_slice %4 {offsets = [208, 0], sizes = [16, 20], strides = [1, 1]} : vector<400x20xf32> to vector<16x20xf32>
    %33 = vector.extract_strided_slice %4 {offsets = [224, 0], sizes = [16, 20], strides = [1, 1]} : vector<400x20xf32> to vector<16x20xf32>
    %34 = tpu.concatenate %25, %26, %27, %28, %29, %30, %31, %32, %33 in 1 : vector<16x20xf32>, vector<16x20xf32>, vector<16x20xf32>, vector<16x20xf32>, vector<16x20xf32>, vector<16x20xf32>, vector<16x20xf32>, vector<16x20xf32>, vector<16x20xf32> -> vector<16x180xf32>
    %35 = vector.extract_strided_slice %4 {offsets = [80, 0], sizes = [16, 20], strides = [1, 1]} : vector<400x20xf32> to vector<16x20xf32>
    %36 = vector.extract_strided_slice %4 {offsets = [96, 0], sizes = [16, 20], strides = [1, 1]} : vector<400x20xf32> to vector<16x20xf32>
    %37 = vector.extract_strided_slice %4 {offsets = [112, 0], sizes = [16, 20], strides = [1, 1]} : vector<400x20xf32> to vector<16x20xf32>
    %38 = vector.extract_strided_slice %4 {offsets = [160, 0], sizes = [16, 20], strides = [1, 1]} : vector<400x20xf32> to vector<16x20xf32>
    %39 = vector.extract_strided_slice %4 {offsets = [176, 0], sizes = [16, 20], strides = [1, 1]} : vector<400x20xf32> to vector<16x20xf32>
    %40 = vector.extract_strided_slice %4 {offsets = [192, 0], sizes = [16, 20], strides = [1, 1]} : vector<400x20xf32> to vector<16x20xf32>
    %41 = vector.extract_strided_slice %4 {offsets = [240, 0], sizes = [16, 20], strides = [1, 1]} : vector<400x20xf32> to vector<16x20xf32>
    %42 = vector.extract_strided_slice %4 {offsets = [256, 0], sizes = [16, 20], strides = [1, 1]} : vector<400x20xf32> to vector<16x20xf32>
    %43 = vector.extract_strided_slice %4 {offsets = [272, 0], sizes = [16, 20], strides = [1, 1]} : vector<400x20xf32> to vector<16x20xf32>
    %44 = tpu.concatenate %35, %36, %37, %38, %39, %40, %41, %42, %43 in 1 : vector<16x20xf32>, vector<16x20xf32>, vector<16x20xf32>, vector<16x20xf32>, vector<16x20xf32>, vector<16x20xf32>, vector<16x20xf32>, vector<16x20xf32>, vector<16x20xf32> -> vector<16x180xf32>
    %45 = vector.extract_strided_slice %4 {offsets = [96, 0], sizes = [16, 20], strides = [1, 1]} : vector<400x20xf32> to vector<16x20xf32>
    %46 = vector.extract_strided_slice %4 {offsets = [112, 0], sizes = [16, 20], strides = [1, 1]} : vector<400x20xf32> to vector<16x20xf32>
    %47 = vector.extract_strided_slice %4 {offsets = [128, 0], sizes = [16, 20], strides = [1, 1]} : vector<400x20xf32> to vector<16x20xf32>
    %48 = vector.extract_strided_slice %4 {offsets = [176, 0], sizes = [16, 20], strides = [1, 1]} : vector<400x20xf32> to vector<16x20xf32>
    %49 = vector.extract_strided_slice %4 {offsets = [192, 0], sizes = [16, 20], strides = [1, 1]} : vector<400x20xf32> to vector<16x20xf32>
    %50 = vector.extract_strided_slice %4 {offsets = [208, 0], sizes = [16, 20], strides = [1, 1]} : vector<400x20xf32> to vector<16x20xf32>
    %51 = vector.extract_strided_slice %4 {offsets = [256, 0], sizes = [16, 20], strides = [1, 1]} : vector<400x20xf32> to vector<16x20xf32>
    %52 = vector.extract_strided_slice %4 {offsets = [272, 0], sizes = [16, 20], strides = [1, 1]} : vector<400x20xf32> to vector<16x20xf32>
    %53 = vector.extract_strided_slice %4 {offsets = [288, 0], sizes = [16, 20], strides = [1, 1]} : vector<400x20xf32> to vector<16x20xf32>
    %54 = tpu.concatenate %45, %46, %47, %48, %49, %50, %51, %52, %53 in 1 : vector<16x20xf32>, vector<16x20xf32>, vector<16x20xf32>, vector<16x20xf32>, vector<16x20xf32>, vector<16x20xf32>, vector<16x20xf32>, vector<16x20xf32>, vector<16x20xf32> -> vector<16x180xf32>
    %55 = vector.extract_strided_slice %4 {offsets = [112, 0], sizes = [16, 20], strides = [1, 1]} : vector<400x20xf32> to vector<16x20xf32>
    %56 = vector.extract_strided_slice %4 {offsets = [128, 0], sizes = [16, 20], strides = [1, 1]} : vector<400x20xf32> to vector<16x20xf32>
    %57 = vector.extract_strided_slice %4 {offsets = [144, 0], sizes = [16, 20], strides = [1, 1]} : vector<400x20xf32> to vector<16x20xf32>
    %58 = vector.extract_strided_slice %4 {offsets = [192, 0], sizes = [16, 20], strides = [1, 1]} : vector<400x20xf32> to vector<16x20xf32>
    %59 = vector.extract_strided_slice %4 {offsets = [208, 0], sizes = [16, 20], strides = [1, 1]} : vector<400x20xf32> to vector<16x20xf32>
    %60 = vector.extract_strided_slice %4 {offsets = [224, 0], sizes = [16, 20], strides = [1, 1]} : vector<400x20xf32> to vector<16x20xf32>
    %61 = vector.extract_strided_slice %4 {offsets = [272, 0], sizes = [16, 20], strides = [1, 1]} : vector<400x20xf32> to vector<16x20xf32>
    %62 = vector.extract_strided_slice %4 {offsets = [288, 0], sizes = [16, 20], strides = [1, 1]} : vector<400x20xf32> to vector<16x20xf32>
    %63 = vector.extract_strided_slice %4 {offsets = [304, 0], sizes = [16, 20], strides = [1, 1]} : vector<400x20xf32> to vector<16x20xf32>
    %64 = tpu.concatenate %55, %56, %57, %58, %59, %60, %61, %62, %63 in 1 : vector<16x20xf32>, vector<16x20xf32>, vector<16x20xf32>, vector<16x20xf32>, vector<16x20xf32>, vector<16x20xf32>, vector<16x20xf32>, vector<16x20xf32>, vector<16x20xf32> -> vector<16x180xf32>
    %65 = vector.extract_strided_slice %4 {offsets = [160, 0], sizes = [16, 20], strides = [1, 1]} : vector<400x20xf32> to vector<16x20xf32>
    %66 = vector.extract_strided_slice %4 {offsets = [176, 0], sizes = [16, 20], strides = [1, 1]} : vector<400x20xf32> to vector<16x20xf32>
    %67 = vector.extract_strided_slice %4 {offsets = [192, 0], sizes = [16, 20], strides = [1, 1]} : vector<400x20xf32> to vector<16x20xf32>
    %68 = vector.extract_strided_slice %4 {offsets = [240, 0], sizes = [16, 20], strides = [1, 1]} : vector<400x20xf32> to vector<16x20xf32>
    %69 = vector.extract_strided_slice %4 {offsets = [256, 0], sizes = [16, 20], strides = [1, 1]} : vector<400x20xf32> to vector<16x20xf32>
    %70 = vector.extract_strided_slice %4 {offsets = [272, 0], sizes = [16, 20], strides = [1, 1]} : vector<400x20xf32> to vector<16x20xf32>
    %71 = vector.extract_strided_slice %4 {offsets = [320, 0], sizes = [16, 20], strides = [1, 1]} : vector<400x20xf32> to vector<16x20xf32>
    %72 = vector.extract_strided_slice %4 {offsets = [336, 0], sizes = [16, 20], strides = [1, 1]} : vector<400x20xf32> to vector<16x20xf32>
    %73 = vector.extract_strided_slice %4 {offsets = [352, 0], sizes = [16, 20], strides = [1, 1]} : vector<400x20xf32> to vector<16x20xf32>
    %74 = tpu.concatenate %65, %66, %67, %68, %69, %70, %71, %72, %73 in 1 : vector<16x20xf32>, vector<16x20xf32>, vector<16x20xf32>, vector<16x20xf32>, vector<16x20xf32>, vector<16x20xf32>, vector<16x20xf32>, vector<16x20xf32>, vector<16x20xf32> -> vector<16x180xf32>
    %75 = vector.extract_strided_slice %4 {offsets = [176, 0], sizes = [16, 20], strides = [1, 1]} : vector<400x20xf32> to vector<16x20xf32>
    %76 = vector.extract_strided_slice %4 {offsets = [192, 0], sizes = [16, 20], strides = [1, 1]} : vector<400x20xf32> to vector<16x20xf32>
    %77 = vector.extract_strided_slice %4 {offsets = [208, 0], sizes = [16, 20], strides = [1, 1]} : vector<400x20xf32> to vector<16x20xf32>
    %78 = vector.extract_strided_slice %4 {offsets = [256, 0], sizes = [16, 20], strides = [1, 1]} : vector<400x20xf32> to vector<16x20xf32>
    %79 = vector.extract_strided_slice %4 {offsets = [272, 0], sizes = [16, 20], strides = [1, 1]} : vector<400x20xf32> to vector<16x20xf32>
    %80 = vector.extract_strided_slice %4 {offsets = [288, 0], sizes = [16, 20], strides = [1, 1]} : vector<400x20xf32> to vector<16x20xf32>
    %81 = vector.extract_strided_slice %4 {offsets = [336, 0], sizes = [16, 20], strides = [1, 1]} : vector<400x20xf32> to vector<16x20xf32>
    %82 = vector.extract_strided_slice %4 {offsets = [352, 0], sizes = [16, 20], strides = [1, 1]} : vector<400x20xf32> to vector<16x20xf32>
    %83 = vector.extract_strided_slice %4 {offsets = [368, 0], sizes = [16, 20], strides = [1, 1]} : vector<400x20xf32> to vector<16x20xf32>
    %84 = tpu.concatenate %75, %76, %77, %78, %79, %80, %81, %82, %83 in 1 : vector<16x20xf32>, vector<16x20xf32>, vector<16x20xf32>, vector<16x20xf32>, vector<16x20xf32>, vector<16x20xf32>, vector<16x20xf32>, vector<16x20xf32>, vector<16x20xf32> -> vector<16x180xf32>
    %85 = vector.extract_strided_slice %4 {offsets = [192, 0], sizes = [16, 20], strides = [1, 1]} : vector<400x20xf32> to vector<16x20xf32>
    %86 = vector.extract_strided_slice %4 {offsets = [208, 0], sizes = [16, 20], strides = [1, 1]} : vector<400x20xf32> to vector<16x20xf32>
    %87 = vector.extract_strided_slice %4 {offsets = [224, 0], sizes = [16, 20], strides = [1, 1]} : vector<400x20xf32> to vector<16x20xf32>
    %88 = vector.extract_strided_slice %4 {offsets = [272, 0], sizes = [16, 20], strides = [1, 1]} : vector<400x20xf32> to vector<16x20xf32>
    %89 = vector.extract_strided_slice %4 {offsets = [288, 0], sizes = [16, 20], strides = [1, 1]} : vector<400x20xf32> to vector<16x20xf32>
    %90 = vector.extract_strided_slice %4 {offsets = [304, 0], sizes = [16, 20], strides = [1, 1]} : vector<400x20xf32> to vector<16x20xf32>
    %91 = vector.extract_strided_slice %4 {offsets = [352, 0], sizes = [16, 20], strides = [1, 1]} : vector<400x20xf32> to vector<16x20xf32>
    %92 = vector.extract_strided_slice %4 {offsets = [368, 0], sizes = [16, 20], strides = [1, 1]} : vector<400x20xf32> to vector<16x20xf32>
    %93 = vector.extract_strided_slice %4 {offsets = [384, 0], sizes = [16, 20], strides = [1, 1]} : vector<400x20xf32> to vector<16x20xf32>
    %94 = tpu.concatenate %85, %86, %87, %88, %89, %90, %91, %92, %93 in 1 : vector<16x20xf32>, vector<16x20xf32>, vector<16x20xf32>, vector<16x20xf32>, vector<16x20xf32>, vector<16x20xf32>, vector<16x20xf32>, vector<16x20xf32>, vector<16x20xf32> -> vector<16x180xf32>
    %95 = tpu.concatenate %14, %24, %34, %44, %54, %64, %74, %84, %94 in 0 : vector<16x180xf32>, vector<16x180xf32>, vector<16x180xf32>, vector<16x180xf32>, vector<16x180xf32>, vector<16x180xf32>, vector<16x180xf32>, vector<16x180xf32>, vector<16x180xf32> -> vector<144x180xf32>
    %96 = arith.truncf %95 : vector<144x180xf32> to vector<144x180xbf16>
    %c0_4 = arith.constant 0 : index
    %c0_5 = arith.constant 0 : index
    %97 = vector.load %arg3[%c0_4, %c0_5] : memref<180x12xbf16, #tpu.memory_space<vmem>>, vector<180x12xbf16>
    %cst_6 = arith.constant dense<0.000000e+00> : vector<144x12xf32>
    %98 = tpu.matmul %96, %97, %cst_6 {dimension_numbers = #tpu.dot_dimension_numbers<[1], [0], [0], [1], [0, 0, 1, 1], [], []>} : vector<144x180xbf16>, vector<180x12xbf16>, vector<144x12xf32> -> vector<144x12xf32>
    %99 = vector.extract_strided_slice %98 {offsets = [0, 0], sizes = [16, 12], strides = [1, 1]} : vector<144x12xf32> to vector<16x12xf32>
    %100 = vector.extract_strided_slice %98 {offsets = [16, 0], sizes = [16, 12], strides = [1, 1]} : vector<144x12xf32> to vector<16x12xf32>
    %101 = vector.extract_strided_slice %98 {offsets = [32, 0], sizes = [16, 12], strides = [1, 1]} : vector<144x12xf32> to vector<16x12xf32>
    %102 = vector.extract_strided_slice %98 {offsets = [48, 0], sizes = [16, 12], strides = [1, 1]} : vector<144x12xf32> to vector<16x12xf32>
    %103 = vector.extract_strided_slice %98 {offsets = [64, 0], sizes = [16, 12], strides = [1, 1]} : vector<144x12xf32> to vector<16x12xf32>
    %104 = vector.extract_strided_slice %98 {offsets = [80, 0], sizes = [16, 12], strides = [1, 1]} : vector<144x12xf32> to vector<16x12xf32>
    %105 = vector.extract_strided_slice %98 {offsets = [96, 0], sizes = [16, 12], strides = [1, 1]} : vector<144x12xf32> to vector<16x12xf32>
    %106 = vector.extract_strided_slice %98 {offsets = [112, 0], sizes = [16, 12], strides = [1, 1]} : vector<144x12xf32> to vector<16x12xf32>
    %107 = vector.extract_strided_slice %98 {offsets = [128, 0], sizes = [16, 12], strides = [1, 1]} : vector<144x12xf32> to vector<16x12xf32>
    %108 = tpu.concatenate %99, %100, %101, %102, %103, %104, %105, %106, %107 in 1 : vector<16x12xf32>, vector<16x12xf32>, vector<16x12xf32>, vector<16x12xf32>, vector<16x12xf32>, vector<16x12xf32>, vector<16x12xf32>, vector<16x12xf32>, vector<16x12xf32> -> vector<16x108xf32>
    %109 = arith.truncf %108 : vector<16x108xf32> to vector<16x108xbf16>
    %c0_7 = arith.constant 0 : index
    %c0_8 = arith.constant 0 : index
    %110 = vector.load %arg4[%c0_7, %c0_8] : memref<108x128xbf16, #tpu.memory_space<vmem>>, vector<108x128xbf16>
    %cst_9 = arith.constant dense<0.000000e+00> : vector<16x128xf32>
    %111 = tpu.matmul %109, %110, %cst_9 {dimension_numbers = #tpu.dot_dimension_numbers<[1], [0], [0], [1], [0, 0, 1, 1], [], []>} : vector<16x108xbf16>, vector<108x128xbf16>, vector<16x128xf32> -> vector<16x128xf32>
    %c0_10 = arith.constant 0 : index
    %c0_11 = arith.constant 0 : index
    %112 = vector.load %arg5[%c0_10, %c0_11] : memref<1x128xf32, #tpu.memory_space<vmem>>, vector<1x128xf32>
    %113 = vector.broadcast %112 : vector<1x128xf32> to vector<16x128xf32>
    %114 = arith.addf %111, %113 : vector<16x128xf32>
    %c0_12 = arith.constant 0 : index
    %c0_13 = arith.constant 0 : index
    %115 = vector.load %arg6[%c0_12, %c0_13] : memref<16x128xf32, #tpu.memory_space<vmem>>, vector<16x128xf32>
    tpu.vector_store %arg6[%c0_12, %c0_13], %114 {strides = array<i32>} : memref<16x128xf32, #tpu.memory_space<vmem>>, vector<16x128xf32>,
    return
  }
  func.func @transform_0(%arg0: i32) -> (i32, i32) {
    %c0_i32 = arith.constant 0 : i32
    %c0_i32_0 = arith.constant 0 : i32
    return %arg0, %c0_i32 : i32, i32
  }
  func.func @transform_1(%arg0: i32) -> (i32, i32) {
    %c0_i32 = arith.constant 0 : i32
    %c0_i32_0 = arith.constant 0 : i32
    %c0_i32_1 = arith.constant 0 : i32
    return %c0_i32, %c0_i32_0 : i32, i32
  }
  func.func @transform_2(%arg0: i32) -> (i32, i32) {
    %c0_i32 = arith.constant 0 : i32
    %c0_i32_0 = arith.constant 0 : i32
    %c0_i32_1 = arith.constant 0 : i32
    return %c0_i32, %c0_i32_0 : i32, i32
  }
  func.func @transform_3(%arg0: i32) -> (i32, i32) {
    %c0_i32 = arith.constant 0 : i32
    %c0_i32_0 = arith.constant 0 : i32
    %c0_i32_1 = arith.constant 0 : i32
    return %c0_i32, %c0_i32_0 : i32, i32
  }
  func.func @transform_4(%arg0: i32) -> (i32, i32) {
    %c0_i32 = arith.constant 0 : i32
    %c0_i32_0 = arith.constant 0 : i32
    %c0_i32_1 = arith.constant 0 : i32
    return %c0_i32, %c0_i32_0 : i32, i32
  }
  func.func @transform_5(%arg0: i32) -> (i32, i32) {
    %c0_i32 = arith.constant 0 : i32
    %c0_i32_0 = arith.constant 0 : i32
    return %arg0, %c0_i32 : i32, i32
  }
}

</mosaic_0001>

<bundles_post_ra>
// kernel: mycnn_forward.1
= control target key start
LH: loop header
LB: loop body
LE: loop exit
PB: predicated region body
PF: predicated region fallthrough
CT: control target
= control target key end

     0   :  { %vm287_vm0 = vcmask 1043456   ;;  %vm288_vm1 = vcmask 1044480   ;;  %v3279_v0 = vmov 0.0   ;;  %v2368_v2 = vmov 65535   ;;  %s2370_s20 = smov 32   ;;  %s2372_s21 = smov 20   ;;  %s3273_s1 = inlined_call_operand.vmem [shape: bf16[25,20], index: 1, kind: input, shape index: {}]   ;;  %s3274_s0 = inlined_call_operand.vmem [shape: bf16[400,25], index: 0, kind: input, shape index: {}]   ;;  %s3275_s2 = inlined_call_operand.vmem [shape: bf16[180,12], index: 2, kind: input, shape index: {}]   ;;  %s3276_s3 = inlined_call_operand.vmem [shape: bf16[108,128], index: 3, kind: input, shape index: {}]   ;;  %s3277_s4 = inlined_call_operand.vmem [shape: f32[1,128], index: 4, kind: input, shape index: {}]   ;;  %s3278_s5 = inlined_call_operand.vmem [shape: f32[16,128], index: 5, kind: output, shape index: {}]  }
   0x1   :  { %1777 = vmatprep.subr.bf16.mxu0 %v3279_v0  ;;  %v2321_v1 = vld [vmem:[%s3273_s1] sm:$0xff]   ;;  %1899 = vmatprep.subr.bf16.mxu1 %v3279_v0  ;;  %v289_v3 = vsel %vm287_vm0, 4294967295, %v2368_v2  ;;  %v2322_v4 = vld [vmem:[%s3273_s1 + $0x8] sm:$0x1f]   ;;  %vm2369_vm2 = vmmov 0   ;;  %v2324_v8 = vld [vmem:[%s3274_s0 + $0x90] sm:$0xff]  }
   0x2   :  { %1778 = vmatpush3.bf16.msra.mxu0 %v2321_v1  ;;  %1901 = vmatpush3.bf16.msra.mxu1 %v2321_v1  ;;  %v290_v5 = vsel %vm288_vm1, %v289_v3, 0  ;;  %v2323_v7 = vld [vmem:[%s3274_s0] sm:$0xff]   ;;  %vm211_vm3 = vcmask 203776   ;;  %v2325_v9 = vld [vmem:[%s3274_s0 + $0x8] sm:$0xff]   ;;  %v2326_v10 = vld [vmem:[%s3274_s0 + $0x98] sm:$0xff]   ;;  %s2373_s22 = smov 40  }
   0x3   :  { %1779 = vmatprep.subr.bf16.mxu0 %v3279_v0  ;;  %v292_v6 = vand.u32 %v2322_v4, %v290_v5  ;;  %1781 = vmatprep.mubr.msk.bf16.mxu0 %vm2369_vm2, %v3279_v0  ;;  %v2327_v11 = vld [vmem:[%s3274_s0 + $0x10] sm:$0xff]   ;;  %v2328_v12 = vld [vmem:[%s3274_s0 + $0xa0] sm:$0xff]   ;;  %v2329_v13 = vld [vmem:[%s3274_s0 + $0x18] sm:$0xff]   ;;  %s2374_s23 = smov 120   ;;  %s2375_s1 = smov 60   ;;  %vm1347_vm4 = vcmask 1041408  }
   0x4   :  { %1900 = vmatprep.subr.bf16.mxu1 %v3279_v0  ;;  %1853 = vmatprep.mubr.msk.bf16.mxu1 %vm2369_vm2, %v3279_v0  ;;  %v2330_v14 = vld [vmem:[%s3274_s0 + $0xa8] sm:$0xff]   ;;  %v2331_v15 = vld [vmem:[%s3274_s0 + $0x20] sm:$0xff]   ;;  %v2345_v16 = vld [vmem:[%s3274_s0 + $0xb0] sm:$0xff]   ;;  %s2377_s28 = smov 80   ;;  %s2378_s8 = smov 100   ;;  %vm659_vm5 = vcmask 97280  }
   0x5   :  { %v2332_v17 = vld [vmem:[%s3274_s0 + $0x28] sm:$0xff]   ;;  %v2346_v18 = vld [vmem:[%s3274_s0 + $0xb8] sm:$0xff]   ;;  %v2333_v19 = vld [vmem:[%s3274_s0 + $0x30] sm:$0xff]   ;;  %vm641_vm6 = vcmask 162816   ;;  %vm644_vm7 = vcmask 326656   ;;  %vm647_vm8 = vcmask 490496  }
   0x6   :  { %1780 = vmatpush3.bf16.msra.mxu0 %v292_v6  ;;  %1902 = vmatpush3.bf16.msra.mxu1 %v292_v6  ;;  %v2347_v20 = vld [vmem:[%s3274_s0 + $0xc0] sm:$0xff]   ;;  %v2334_v21 = vld [vmem:[%s3274_s0 + $0x38] sm:$0xff]   ;;  %v2336_v23 = vld [vmem:[%s3274_s0 + $0x48] sm:$0xff]   ;;  %vm650_vm9 = vcmask 654336   ;;  %vm653_vm10 = vcmask 818176   ;;  %vm656_vm11 = vcmask 982016  }
   0x7   :  { %v2335_v22 = vld [vmem:[%s3274_s0 + $0x40] sm:$0xff]   ;;  %v2337_v24 = vld [vmem:[%s3274_s0 + $0x50] sm:$0xff]   ;;  %v2338_v25 = vld [vmem:[%s3274_s0 + $0x58] sm:$0xff]   ;;  %vm662_vm12 = vcmask 261120   ;;  %vm1319_vm13 = vcmask 424960   ;;  %s2379_s30 = smov 24  }
   0x8   :  { %v2339_v26 = vld [vmem:[%s3274_s0 + $0x60] sm:$0xff]   ;;  %v2340_v27 = vld [vmem:[%s3274_s0 + $0x68] sm:$0xff]   ;;  %v2341_v28 = vld [vmem:[%s3274_s0 + $0x70] sm:$0xff]   ;;  %s2380_s9 = smov 36   ;;  %s2381_s10 = smov 48   ;;  %vm1609_vm14 = vcmask 1045504  }
   0x9   :  { %1782 = vmatmul.mubr.msk.bf16.vlgmr.msra.gmra.mrb[0].mxu0 %vm211_vm3, %v2323_v7  ;;  %1854 = vmatmul.mubr.msk.bf16.vlgmr.msra.gmra.mrb[0].mxu1 %vm211_vm3, %v2324_v8  ;;  %v2342_v29 = vld [vmem:[%s3274_s0 + $0x78] sm:$0xff]   ;;  %v2343_v30 = vld [vmem:[%s3274_s0 + $0x80] sm:$0xff]   ;;  %v2344_v31 = vld [vmem:[%s3274_s0 + $0x88] sm:$0xff]   ;;  %s2371_s0 = smov 12   ;;  %s2382_s15 = smov 72   ;;  %vm1522_vm15 = vcmask 195584  }
   0xa   :  { %1785 = vmatprep.mubr.msk.bf16.mxu0 %vm2369_vm2, %v3279_v0  ;;  %1857 = vmatprep.mubr.msk.bf16.mxu1 %vm2369_vm2, %v3279_v0  ;;  %vm1525_vm0 = vcmask 293888   ;;  %vm1528_vm1 = vcmask 392192  }
  0x11   :  { %1786 = vmatmul.mubr.msk.bf16.gmra.mrb[4].mxu0 %vm211_vm3, %v2325_v9  ;;  %1858 = vmatmul.mubr.msk.bf16.gmra.mrb[4].mxu1 %vm211_vm3, %v2326_v10 }
  0x12   :  { %1789 = vmatprep.mubr.msk.bf16.mxu0 %vm2369_vm2, %v3279_v0  ;;  %1861 = vmatprep.mubr.msk.bf16.mxu1 %vm2369_vm2, %v3279_v0 }
  0x19   :  { %1790 = vmatmul.mubr.msk.bf16.gmra.mrb[8].mxu0 %vm211_vm3, %v2327_v11  ;;  %1862 = vmatmul.mubr.msk.bf16.gmra.mrb[8].mxu1 %vm211_vm3, %v2328_v12 }
  0x1a   :  { %1793 = vmatprep.mubr.msk.bf16.mxu0 %vm2369_vm2, %v3279_v0  ;;  %1865 = vmatprep.mubr.msk.bf16.mxu1 %vm2369_vm2, %v3279_v0 }
  0x21   :  { %1794 = vmatmul.mubr.msk.bf16.gmra.mrb[12].mxu0 %vm211_vm3, %v2329_v13  ;;  %1866 = vmatmul.mubr.msk.bf16.gmra.mrb[12].mxu1 %vm211_vm3, %v2330_v14 }
  0x22   :  { %1797 = vmatprep.mubr.msk.bf16.mxu0 %vm2369_vm2, %v3279_v0  ;;  %1869 = vmatprep.mubr.msk.bf16.mxu1 %vm2369_vm2, %v3279_v0 }
  0x29   :  { %1798 = vmatmul.mubr.msk.bf16.gmra.mrb[16].mxu0 %vm211_vm3, %v2331_v15  ;;  %1870 = vmatmul.mubr.msk.bf16.gmra.mrb[16].mxu1 %vm211_vm3, %v2345_v16 }
  0x2a   :  { %1801 = vmatprep.mubr.msk.bf16.mxu0 %vm2369_vm2, %v3279_v0  ;;  %1873 = vmatprep.mubr.msk.bf16.mxu1 %vm2369_vm2, %v3279_v0 }
  0x31   :  { %1802 = vmatmul.mubr.msk.bf16.gmra.mrb[20].mxu0 %vm211_vm3, %v2332_v17  ;;  %1874 = vmatmul.mubr.msk.bf16.gmra.mrb[20].mxu1 %vm211_vm3, %v2346_v18 }
  0x32   :  { %1805 = vmatprep.mubr.msk.bf16.mxu0 %vm2369_vm2, %v3279_v0  ;;  %1877 = vmatprep.mubr.msk.bf16.mxu1 %vm2369_vm2, %v3279_v0 }
  0x39   :  { %1806 = vmatmul.mubr.msk.bf16.gmra.mrb[24].mxu0 %vm211_vm3, %v2333_v19  ;;  %1878 = vmatmul.mubr.msk.bf16.gmra.mrb[24].mxu1 %vm211_vm3, %v2347_v20 }
  0x3a   :  { %1809 = vmatprep.mubr.msk.bf16.mxu0 %vm2369_vm2, %v3279_v0 }
  0x41   :  { %1810 = vmatmul.mubr.msk.bf16.gmra.mrb[28].mxu0 %vm211_vm3, %v2334_v21 }
  0x42   :  { %1813 = vmatprep.mubr.msk.bf16.mxu0 %vm2369_vm2, %v3279_v0 }
  0x49   :  { %1814 = vmatmul.mubr.msk.bf16.gmra.mrb[32].mxu0 %vm211_vm3, %v2335_v22 }
  0x4a   :  { %1817 = vmatprep.mubr.msk.bf16.mxu0 %vm2369_vm2, %v3279_v0 }
  0x51   :  { %1818 = vmatmul.mubr.msk.bf16.gmra.mrb[36].mxu0 %vm211_vm3, %v2336_v23 }
  0x52   :  { %1821 = vmatprep.mubr.msk.bf16.mxu0 %vm2369_vm2, %v3279_v0 }
  0x59   :  { %1822 = vmatmul.mubr.msk.bf16.gmra.mrb[40].mxu0 %vm211_vm3, %v2337_v24 }
  0x5a   :  { %1825 = vmatprep.mubr.msk.bf16.mxu0 %vm2369_vm2, %v3279_v0 }
  0x61   :  { %1826 = vmatmul.mubr.msk.bf16.gmra.mrb[44].mxu0 %vm211_vm3, %v2338_v25 }
  0x62   :  { %1829 = vmatprep.mubr.msk.bf16.mxu0 %vm2369_vm2, %v3279_v0 }
  0x69   :  { %1830 = vmatmul.mubr.msk.bf16.gmra.mrb[48].mxu0 %vm211_vm3, %v2339_v26 }
  0x6a   :  { %1833 = vmatprep.mubr.msk.bf16.mxu0 %vm2369_vm2, %v3279_v0 }
  0x71   :  { %1834 = vmatmul.mubr.msk.bf16.gmra.mrb[52].mxu0 %vm211_vm3, %v2340_v27 }
  0x72   :  { %1837 = vmatprep.mubr.msk.bf16.mxu0 %vm2369_vm2, %v3279_v0 }
  0x79   :  { %1838 = vmatmul.mubr.msk.bf16.gmra.mrb[56].mxu0 %vm211_vm3, %v2341_v28 }
  0x7a   :  { %1841 = vmatprep.mubr.msk.bf16.mxu0 %vm2369_vm2, %v3279_v0 }
  0x81   :  { %1842 = vmatmul.mubr.msk.bf16.gmra.mrb[60].mxu0 %vm211_vm3, %v2342_v29 }
  0x82   :  { %1845 = vmatprep.mubr.msk.bf16.mxu0 %vm2369_vm2, %v3279_v0 }
  0x89   :  { %1846 = vmatmul.mubr.msk.bf16.gmra.mrb[64].mxu0 %vm211_vm3, %v2343_v30 }
  0x8a   :  { %1849 = vmatprep.mubr.msk.bf16.mxu0 %vm2369_vm2, %v3279_v0 }
  0x91   :  { %1850 = vmatmul.mubr.msk.bf16.gmra.mrb[68].mxu0 %vm211_vm3, %v2344_v31  ;;  %vm1536_vm3 = vcmask 687104  }
  0xdc   :  { %v2575_v32 = vpop.f32.mrb[0].mxu0  ;;  %v472_v33 = vpop.f32.mrb[0].mxu1 }
  0xdd   :  { %v1783_v34 = vpop.f32.mrb[1].mxu0  ;;  %v563_v35 = vmax.f32 %v472_v33, 0.0  ;;  %v1855_v36 = vpop.f32.mrb[1].mxu1 }
  0xde   :  { %v2577_v37 = vpop.f32.mrb[2].mxu0  ;;  %v475_v38 = vpop.f32.mrb[2].mxu1 }
  0xdf   :  { %v1784_v39 = vpop.f32.mrb[3].mxu0  ;;  %v564_v40 = vmax.f32 %v475_v38, 0.0  ;;  %v1856_v41 = vpop.f32.mrb[3].mxu1 }
  0xe1   :  { %v2579_v42 = vpack.i.bf16 %v564_v40, %v563_v35 }
  0xe3   :  { %1922 = vrot.lane.b32.xlu1 %v2579_v42, %s2370_s20 }
  0xe4   :  { %v2583_v43 = vpop.f32.mrb[4].mxu0  ;;  %v480_v44 = vpop.f32.mrb[4].mxu1 }
  0xe5   :  { %v1787_v45 = vpop.f32.mrb[5].mxu0  ;;  %v565_v46 = vmax.f32 %v480_v44, 0.0  ;;  %v1859_v47 = vpop.f32.mrb[5].mxu1  ;;  %v529_v50 = vmax.f32 %v2583_v43, 0.0 }
  0xe6   :  { %v2585_v48 = vpop.f32.mrb[6].mxu0  ;;  %v483_v49 = vpop.f32.mrb[6].mxu1 }
  0xe7   :  { %v530_v51 = vmax.f32 %v2585_v48, 0.0  ;;  %v1788_v52 = vpop.f32.mrb[7].mxu0  ;;  %v566_v53 = vmax.f32 %v483_v49, 0.0  ;;  %1927 = vrot.lane.b32.xlu1 %v2579_v42, %s2371_s0  ;;  %v1860_v54 = vpop.f32.mrb[7].mxu1 }
  0xe9   :  { %v1931_v55 = vpack.i.bf16 %v530_v51, %v529_v50  ;;  %v2595_v56 = vpack.i.bf16 %v566_v53, %v565_v46 }
  0xeb   :  { %1932 = vrot.lane.b32.xlu0 %v1931_v55, %s2372_s21  ;;  %1937 = vrot.lane.b32.xlu1 %v2595_v56, %s2370_s20 }
  0xec   :  { %v2600_v57 = vpop.f32.mrb[8].mxu0  ;;  %v488_v58 = vpop.f32.mrb[8].mxu1 }
  0xed   :  { %v1791_v59 = vpop.f32.mrb[9].mxu0  ;;  %v567_v60 = vmax.f32 %v488_v58, 0.0  ;;  %v1863_v61 = vpop.f32.mrb[9].mxu1  ;;  %v531_v1 = vmax.f32 %v2600_v57, 0.0 }
  0xee   :  { %v2602_v62 = vpop.f32.mrb[10].mxu0  ;;  %v491_v63 = vpop.f32.mrb[10].mxu1  ;;  %v2348_v61 = vld [vmem:[%s3275_s2] sm:$0xff]  }
  0xef   :  { %v532_v2 = vmax.f32 %v2602_v62, 0.0  ;;  %v1792_v3 = vpop.f32.mrb[11].mxu0  ;;  %v568_v4 = vmax.f32 %v491_v63, 0.0  ;;  %v1864_v5 = vpop.f32.mrb[11].mxu1 }
  0xf1   :  { %v1941_v6 = vpack.i.bf16 %v532_v2, %v531_v1  ;;  %v1951_v7 = vpack.i.bf16 %v568_v4, %v567_v60 }
  0xf3   :  { %1942 = vrot.lane.b32.xlu0 %v1941_v6, %s2373_s22 }
  0xf4   :  { %v352_v8 = vpop.f32.mrb[12].mxu0  ;;  %v496_v9 = vpop.f32.mrb[12].mxu1 }
  0xf5   :  { %v1795_v10 = vpop.f32.mrb[13].mxu0  ;;  %v569_v11 = vmax.f32 %v496_v9, 0.0  ;;  %v1867_v12 = vpop.f32.mrb[13].mxu1  ;;  %v533_v15 = vmax.f32 %v352_v8, 0.0 }
  0xf6   :  { %v355_v13 = vpop.f32.mrb[14].mxu0  ;;  %v499_v14 = vpop.f32.mrb[14].mxu1 }
  0xf7   :  { %v534_v16 = vmax.f32 %v355_v13, 0.0  ;;  %1947 = vrot.lane.b32.xlu0 %v1941_v6, %s2372_s21  ;;  %v1796_v17 = vpop.f32.mrb[15].mxu0  ;;  %v570_v18 = vmax.f32 %v499_v14, 0.0  ;;  %v1868_v19 = vpop.f32.mrb[15].mxu1  ;;  %v2376_v6 = vmov 0   ;;  %v2349_v13 = vld [vmem:[%s3275_s2 + $0x8] sm:$0xff]  }
  0xf8   :  { %1351 = vmatprep.subr.bf16.mxu1 %v2376_v6  ;;  %v2350_v17 = vld [vmem:[%s3275_s2 + $0x10] sm:$0xff]  }
  0xf9   :  { %v1961_v20 = vpack.i.bf16 %v534_v16, %v533_v15  ;;  %v2612_v21 = vpack.i.bf16 %v570_v18, %v569_v11  ;;  %1352 = vmatpush1.bf16.msra.mxu1 %v2348_v61  ;;  %v2356_v61 = vld [vmem:[%s3275_s2 + $0x40] sm:$0xff]  }
  0xfa   :  { %1353 = vmatprep.subr.bf16.mxu1 %v2376_v6 }
  0xfb   :  { %1952 = vrot.lane.b32.xlu0 %v1951_v7, %s2374_s23  ;;  %1957 = vrot.lane.b32.xlu1 %v1961_v20, %s2373_s22 }
  0xfc   :  { %v360_v22 = vpop.f32.mrb[16].mxu0  ;;  %v504_v23 = vpop.f32.mrb[16].mxu1 }
  0xfd   :  { %v1799_v24 = vpop.f32.mrb[17].mxu0  ;;  %v571_v25 = vmax.f32 %v504_v23, 0.0  ;;  %v1871_v26 = vpop.f32.mrb[17].mxu1  ;;  %v535_v29 = vmax.f32 %v360_v22, 0.0  ;;  %1354 = vmatpush1.bf16.msra.mxu1 %v2349_v13 }
  0xfe   :  { %v363_v27 = vpop.f32.mrb[18].mxu0  ;;  %v507_v28 = vpop.f32.mrb[18].mxu1  ;;  %1355 = vmatprep.subr.bf16.mxu1 %v2376_v6  ;;  %v2351_v24 = vld [vmem:[%s3275_s2 + $0x18] sm:$0xff]  }
  0xff   :  { %v536_v30 = vmax.f32 %v363_v27, 0.0  ;;  %1962 = vrot.lane.b32.xlu0 %v1961_v20, %s2372_s21  ;;  %1967 = vrot.lane.b32.xlu1 %v2612_v21, %s2371_s0  ;;  %v1800_v31 = vpop.f32.mrb[19].mxu0  ;;  %v572_v33 = vmax.f32 %v507_v28, 0.0  ;;  %v1872_v34 = vpop.f32.mrb[19].mxu1  ;;  %v2352_v27 = vld [vmem:[%s3275_s2 + $0x20] sm:$0xff]  }
 0x100   :  { %v2353_v34 = vld [vmem:[%s3275_s2 + $0x28] sm:$0xff]  }
 0x101   :  { %v1971_v35 = vpack.i.bf16 %v536_v30, %v535_v29  ;;  %v2619_v36 = vpack.i.bf16 %v572_v33, %v571_v25  ;;  %1356 = vmatpush1.bf16.msra.mxu1 %v2350_v17 }
 0x102   :  { %1357 = vmatprep.subr.bf16.mxu1 %v2376_v6 }
 0x103   :  { %1972 = vrot.lane.b32.xlu1 %v1971_v35, %s2373_s22 }
 0x104   :  { %v2622_v38 = vpop.f32.mrb[20].mxu0  ;;  %v512_v39 = vpop.f32.mrb[20].mxu1 }
 0x105   :  { %v1803_v40 = vpop.f32.mrb[21].mxu0  ;;  %v573_v41 = vmax.f32 %v512_v39, 0.0  ;;  %v1875_v44 = vpop.f32.mrb[21].mxu1  ;;  %v537_v47 = vmax.f32 %v2622_v38, 0.0  ;;  %1358 = vmatpush1.bf16.msra.mxu1 %v2351_v24 }
 0x106   :  { %v2624_v45 = vpop.f32.mrb[22].mxu0  ;;  %v515_v46 = vpop.f32.mrb[22].mxu1  ;;  %1359 = vmatprep.subr.bf16.mxu1 %v2376_v6  ;;  %v2354_v40 = vld [vmem:[%s3275_s2 + $0x30] sm:$0xff]  }
 0x107   :  { %v538_v49 = vmax.f32 %v2624_v45, 0.0  ;;  %v1804_v52 = vpop.f32.mrb[23].mxu0  ;;  %v574_v53 = vmax.f32 %v515_v46, 0.0  ;;  %v1876_v54 = vpop.f32.mrb[23].mxu1 }
 0x108   :  { %v2355_v54 = vld [vmem:[%s3275_s2 + $0x38] sm:$0xff]  }
 0x109   :  { %v1976_v55 = vpack.i.bf16 %v538_v49, %v537_v47  ;;  %v2632_v58 = vpack.i.bf16 %v574_v53, %v573_v41  ;;  %1360 = vmatpush1.bf16.msra.mxu1 %v2352_v27 }
 0x10a   :  { %1361 = vmatprep.subr.bf16.mxu1 %v2376_v6 }
 0x10b   :  { %1977 = vrot.lane.b32.xlu1 %v1976_v55, %s2375_s1 }
 0x10c   :  { %v2635_v59 = vpop.f32.mrb[24].mxu0  ;;  %v520_v60 = vpop.f32.mrb[24].mxu1 }
 0x10d   :  { %v3289_v63 = vmax.f32 %v2635_v59, 0.0  ;;  %v1807_v3 = vpop.f32.mrb[25].mxu0  ;;  %v575_v4 = vmax.f32 %v520_v60, 0.0  ;;  %v1879_v5 = vpop.f32.mrb[25].mxu1  ;;  %1362 = vmatpush1.bf16.msra.mxu1 %v2353_v34 }
 0x10e   :  { %v2642_v7 = vpop.f32.mrb[26].mxu0  ;;  %v523_v8 = vpop.f32.mrb[26].mxu1  ;;  %1363 = vmatprep.subr.bf16.mxu1 %v2376_v6 }
 0x10f   :  { %v540_v9 = vmax.f32 %v2642_v7, 0.0  ;;  %v1808_v10 = vpop.f32.mrb[27].mxu0  ;;  %v576_v11 = vmax.f32 %v523_v8, 0.0  ;;  %v1880_v12 = vpop.f32.mrb[27].mxu1 }
 0x111   :  { %v1986_v14 = vpack.i.bf16 %v540_v9, %v3289_v63  ;;  %v2653_v15 = vpack.i.bf16 %v576_v11, %v575_v4  ;;  %1364 = vmatpush1.bf16.msra.mxu1 %v2354_v40  ;;  %v2357_v11 = vld [vmem:[%s3275_s2 + $0x48] sm:$0xff]  }
 0x112   :  { %1365 = vmatprep.subr.bf16.mxu1 %v2376_v6 }
 0x113   :  { %1987 = vrot.lane.b32.xlu0 %v1986_v14, %s2375_s1  ;;  %1982 = vrot.lane.b32.xlu1 %v1986_v14, %s2377_s28 }
 0x114   :  { %v2657_v16 = vpop.f32.mrb[28].mxu0 }
 0x115   :  { %v1811_v18 = vpop.f32.mrb[29].mxu0  ;;  %v541_v19 = vmax.f32 %v2657_v16, 0.0  ;;  %1366 = vmatpush1.bf16.msra.mxu1 %v2355_v54 }
 0x116   :  { %v2664_v20 = vpop.f32.mrb[30].mxu0  ;;  %1367 = vmatprep.subr.bf16.mxu1 %v2376_v6 }
 0x117   :  { %v542_v22 = vmax.f32 %v2664_v20, 0.0  ;;  %1992 = vrot.lane.b32.xlu0 %v1986_v14, %s2372_s21  ;;  %v1812_v23 = vpop.f32.mrb[31].mxu0  ;;  %v2358_v14 = vld [vmem:[%s3275_s2 + $0x50] sm:$0xff]  }
 0x119   :  { %v2001_v25 = vpack.i.bf16 %v542_v22, %v541_v19  ;;  %1368 = vmatpush1.bf16.msra.mxu1 %v2356_v61 }
 0x11a   :  { %1369 = vmatprep.subr.bf16.mxu1 %v2376_v6 }
 0x11b   :  { %2002 = vrot.lane.b32.xlu1 %v2001_v25, %s2377_s28  ;;  %1997 = vrot.lane.b32.xlu0 %v2001_v25, %s2378_s8 }
 0x11c   :  { %v392_v26 = vpop.f32.mrb[32].mxu0 }
 0x11d   :  { %v1815_v28 = vpop.f32.mrb[33].mxu0  ;;  %v543_v30 = vmax.f32 %v392_v26, 0.0  ;;  %1370 = vmatpush1.bf16.msra.mxu1 %v2357_v11  ;;  %v2359_v26 = vld [vmem:[%s3275_s2 + $0x58] ss:$0 sps:$4 sm:$0x33]  }
 0x11e   :  { %v395_v29 = vpop.f32.mrb[34].mxu0  ;;  %1371 = vmatprep.subr.bf16.mxu1 %v2376_v6  ;;  %v1349_v28 = vsel %vm1347_vm4, %v2359_v26, 0  ;;  %vm1539_vm4 = vcmask 785408  }
 0x11f   :  { %v544_v31 = vmax.f32 %v395_v29, 0.0  ;;  %2012 = vrot.lane.b32.xlu1 %v2001_v25, %s2373_s22  ;;  %2007 = vrot.lane.b32.xlu0 %v2001_v25, %s2375_s1  ;;  %v1816_v33 = vpop.f32.mrb[35].mxu0 }
 0x121   :  { %v2026_v35 = vpack.i.bf16 %v544_v31, %v543_v30  ;;  %1372 = vmatpush1.bf16.msra.mxu1 %v2358_v14 }
 0x122   :  { %1373 = vmatprep.subr.bf16.mxu1 %v2376_v6 }
 0x123   :  { %2017 = vrot.lane.b32.xlu0 %v2001_v25, %s2372_s21  ;;  %2027 = vrot.lane.b32.xlu1 %v2026_v35, %s2377_s28 }
 0x124   :  { %v400_v39 = vpop.f32.mrb[36].mxu0 }
 0x125   :  { %v1819_v41 = vpop.f32.mrb[37].mxu0  ;;  %v545_v46 = vmax.f32 %v400_v39, 0.0  ;;  %1374 = vmatpush1.bf16.msra.mxu1 %v1349_v28 }
 0x126   :  { %v403_v44 = vpop.f32.mrb[38].mxu0  ;;  %1881 = vmatprep.subr.bf16.mxu1 %v3279_v0  ;;  %v527_v0 = vmax.f32 %v2575_v32, 0.0 }
 0x127   :  { %v546_v52 = vmax.f32 %v403_v44, 0.0  ;;  %2032 = vrot.lane.b32.xlu1 %v2026_v35, %s2373_s22  ;;  %2022 = vrot.lane.b32.xlu0 %v2026_v35, %s2378_s8  ;;  %v1820_v53 = vpop.f32.mrb[39].mxu0 }
 0x129   :  { %v2046_v55 = vpack.i.bf16 %v546_v52, %v545_v46 }
 0x12b   :  { %2037 = vrot.lane.b32.xlu0 %v2026_v35, %s2372_s21  ;;  %2047 = vrot.lane.b32.xlu1 %v2046_v55, %s2373_s22 }
 0x12c   :  { %v2702_v60 = vpop.f32.mrb[40].mxu0 }
 0x12d   :  { %v1823_v3 = vpop.f32.mrb[41].mxu0  ;;  %v3287_v5 = vmax.f32 %v2702_v60, 0.0 }
 0x12e   :  { %v2708_v4 = vpop.f32.mrb[42].mxu0 }
 0x12f   :  { %v3288_v8 = vmax.f32 %v2708_v4, 0.0  ;;  %2042 = vrot.lane.b32.xlu0 %v2046_v55, %s2378_s8  ;;  %v1824_v10 = vpop.f32.mrb[43].mxu0 }
 0x131   :  { %v2051_v12 = vpack.i.bf16 %v3288_v8, %v3287_v5 }
 0x133   :  { %2052 = vrot.lane.b32.xlu0 %v2051_v12, %s2374_s23 }
 0x134   :  { %v2723_v13 = vpop.f32.mrb[44].mxu0 }
 0x135   :  { %v1827_v17 = vpop.f32.mrb[45].mxu0  ;;  %v3286_v23 = vmax.f32 %v2723_v13, 0.0 }
 0x136   :  { %v2728_v18 = vpop.f32.mrb[46].mxu0 }
 0x137   :  { %v3285_v24 = vmax.f32 %v2728_v18, 0.0  ;;  %2057 = vrot.lane.b32.xlu0 %v2051_v12, %s2375_s1  ;;  %v1828_v25 = vpop.f32.mrb[47].mxu0 }
 0x139   :  { %v2066_v27 = vpack.i.bf16 %v3285_v24, %v3286_v23 }
 0x13b   :  { %2067 = vrot.lane.b32.xlu0 %v2066_v27, %s2374_s23  ;;  %2062 = vrot.lane.b32.xlu1 %v2066_v27, %s2371_s0 }
 0x13c   :  { %v2743_v29 = vpop.f32.mrb[48].mxu0 }
 0x13d   :  { %v1831_v30 = vpop.f32.mrb[49].mxu0  ;;  %v3281_v31 = vmax.f32 %v2743_v29, 0.0 }
 0x13e   :  { %v2746_v6 = vpop.f32.mrb[50].mxu0 }
 0x13f   :  { %v3282_v33 = vmax.f32 %v2746_v6, 0.0  ;;  %2077 = vrot.lane.b32.xlu0 %v2066_v27, %s2375_s1  ;;  %2072 = vrot.lane.b32.xlu1 %v2066_v27, %s2377_s28  ;;  %v1832_v34 = vpop.f32.mrb[51].mxu0 }
 0x141   :  { %v2086_v35 = vpack.i.bf16 %v3282_v33, %v3281_v31  ;;  %v528_v31 = vmax.f32 %v2577_v37, 0.0 }
 0x143   :  { %2082 = vrot.lane.b32.xlu0 %v2066_v27, %s2372_s21  ;;  %2087 = vrot.lane.b32.xlu1 %v2086_v35, %s2370_s20 }
 0x144   :  { %v432_v39 = vpop.f32.mrb[52].mxu0 }
 0x145   :  { %v1835_v40 = vpop.f32.mrb[53].mxu0  ;;  %v553_v44 = vmax.f32 %v432_v39, 0.0 }
 0x146   :  { %v435_v41 = vpop.f32.mrb[54].mxu0 }
 0x147   :  { %v554_v46 = vmax.f32 %v435_v41, 0.0  ;;  %2097 = vrot.lane.b32.xlu0 %v2086_v35, %s2374_s23  ;;  %2092 = vrot.lane.b32.xlu1 %v2086_v35, %s2371_s0  ;;  %v1836_v52 = vpop.f32.mrb[55].mxu0 }
 0x149   :  { %v2760_v53 = vpack.i.bf16 %v554_v46, %v553_v44 }
 0x14b   :  { %2102 = vrot.lane.b32.xlu0 %v2086_v35, %s2378_s8  ;;  %2107 = vrot.lane.b32.xlu1 %v2086_v35, %s2377_s28 }
 0x14c   :  { %v440_v54 = vpop.f32.mrb[56].mxu0 }
 0x14d   :  { %v1839_v55 = vpop.f32.mrb[57].mxu0  ;;  %v555_v3 = vmax.f32 %v440_v54, 0.0 }
 0x14e   :  { %v443_v61 = vpop.f32.mrb[58].mxu0 }
 0x14f   :  { %v556_v10 = vmax.f32 %v443_v61, 0.0  ;;  %2112 = vrot.lane.b32.xlu0 %v2086_v35, %s2375_s1  ;;  %2117 = vrot.lane.b32.xlu1 %v2086_v35, %s2373_s22  ;;  %v1840_v11 = vpop.f32.mrb[59].mxu0 }
 0x151   :  { %v2766_v12 = vpack.i.bf16 %v556_v10, %v555_v3 }
 0x153   :  { %2132 = vrot.lane.b32.xlu0 %v2760_v53, %s2378_s8  ;;  %2122 = vrot.lane.b32.xlu1 %v2760_v53, %s2370_s20 }
 0x154   :  { %v448_v14 = vpop.f32.mrb[60].mxu0 }
 0x155   :  { %v1843_v17 = vpop.f32.mrb[61].mxu0  ;;  %v557_v26 = vmax.f32 %v448_v14, 0.0  ;;  %v2779_v34 = vpop.permute.xlu1 %1922 }
 0x156   :  { %v451_v25 = vpop.f32.mrb[62].mxu0 }
 0x157   :  { %v558_v27 = vmax.f32 %v451_v25, 0.0  ;;  %2127 = vrot.lane.b32.xlu1 %v2760_v53, %s2371_s0  ;;  %2147 = vrot.lane.b32.xlu0 %v2766_v12, %s2378_s8  ;;  %v1844_v28 = vpop.f32.mrb[63].mxu0 }
 0x159   :  { %v2156_v30 = vpack.i.bf16 %v558_v27, %v557_v26  ;;  %v2786_v61 = vpop.permute.xlu1 %1927 }
 0x15b   :  { %2137 = vrot.lane.b32.xlu1 %v2760_v53, %s2377_s28  ;;  %2152 = vrot.lane.b32.xlu0 %v2156_v30, %s2374_s23 }
 0x15c   :  { %v456_v39 = vpop.f32.mrb[64].mxu0 }
 0x15d   :  { %v1847_v40 = vpop.f32.mrb[65].mxu0  ;;  %v559_v44 = vmax.f32 %v456_v39, 0.0  ;;  %v2784_v54 = vpop.permute.xlu0 %1932 }
 0x15e   :  { %v459_v41 = vpop.f32.mrb[66].mxu0  ;;  %v2794_v27 = vpop.permute.xlu1 %1937  ;;  %v1934_v33 = vunpack.i.l.bf16 %v2784_v54 }
 0x15f   :  { %v560_v46 = vmax.f32 %v459_v41, 0.0  ;;  %2142 = vrot.lane.b32.xlu1 %v2766_v12, %s2370_s20  ;;  %2157 = vrot.lane.b32.xlu0 %v2156_v30, %s2375_s1  ;;  %v1848_v52 = vpop.f32.mrb[67].mxu0 }
 0x161   :  { %v2166_v55 = vpack.i.bf16 %v560_v46, %v559_v44 }
 0x163   :  { %2167 = vrot.lane.b32.xlu0 %v2166_v55, %s2374_s23  ;;  %2162 = vrot.lane.b32.xlu1 %v2166_v55, %s2371_s0 }
 0x164   :  { %v464_v3 = vpop.f32.mrb[68].mxu0 }
 0x165   :  { %v2790_v10 = vpop.permute.xlu0 %1942  ;;  %v1851_v11 = vpop.f32.mrb[69].mxu0  ;;  %v561_v17 = vmax.f32 %v464_v3, 0.0 }
 0x166   :  { %v467_v14 = vpop.f32.mrb[70].mxu0 }
 0x167   :  { %v562_v25 = vmax.f32 %v467_v14, 0.0  ;;  %2192 = vrot.lane.b32.xlu0 %v2086_v35, %s2372_s21  ;;  %2172 = vrot.lane.b32.xlu1 %v2166_v55, %s2377_s28  ;;  %v1852_v26 = vpop.f32.mrb[71].mxu0 }
 0x169   :  { %v2796_v28 = vpop.permute.xlu0 %1947  ;;  %v2176_v30 = vpack.i.bf16 %v562_v25, %v561_v17 }
 0x16b   :  { %2202 = vrot.lane.b32.xlu0 %v2166_v55, %s2375_s1  ;;  %2177 = vrot.lane.b32.xlu1 %v2176_v30, %s2370_s20 }
 0x16d   :  { %v2800_v39 = vpop.permute.xlu0 %1952  ;;  %v2802_v40 = vpop.permute.xlu1 %1957 }
 0x16e   :  { %v3283_v35 = vunpack.i.h.bf16 %v2800_v39  ;;  %v3284_v41 = vunpack.i.l.bf16 %v2800_v39 }
 0x16f   :  { %2207 = vrot.lane.b32.xlu0 %v2176_v30, %s2374_s23  ;;  %2182 = vrot.lane.b32.xlu1 %v2176_v30, %s2371_s0 }
 0x171   :  { %v1963_v44 = vpop.permute.xlu0 %1962  ;;  %v1968_v46 = vpop.permute.xlu1 %1967 }
 0x172   :  { %v1970_v52 = vunpack.i.h.bf16 %v1968_v46  ;;  %v1969_v3 = vunpack.i.l.bf16 %v1968_v46  ;;  %v1965_v55 = vunpack.i.h.bf16 %v1963_v44  ;;  %v1964_v11 = vunpack.i.l.bf16 %v1963_v44 }
 0x173   :  { %2212 = vrot.lane.b32.xlu0 %v2612_v21, %s2374_s23  ;;  %2187 = vrot.lane.b32.xlu1 %v2619_v36, %s2370_s20 }
 0x174   :  { %v2815_v14 = vsel %vm659_vm5, %v3283_v35, %v1970_v52  ;;  %v2820_v17 = vsel %vm659_vm5, %v3284_v41, %v1969_v3  ;;  %v790_v21 = vsel %vm641_vm6, %v532_v2, %v1965_v55  ;;  %v789_v46 = vsel %vm641_vm6, %v531_v1, %v1964_v11 }
 0x175   :  { %v1973_v25 = vpop.permute.xlu1 %1972  ;;  %v1945_v35 = vunpack.i.h.bf16 %v2790_v10  ;;  %v1944_v41 = vunpack.i.l.bf16 %v2790_v10 }
 0x176   :  { %v1975_v26 = vunpack.i.h.bf16 %v1973_v25  ;;  %v1974_v44 = vunpack.i.l.bf16 %v1973_v25 }
 0x177   :  { %2222 = vrot.lane.b32.xlu0 %v2579_v42, %s2378_s8  ;;  %2197 = vrot.lane.b32.xlu1 %v2760_v53, %s2373_s22 }
 0x178   :  { %v2833_v52 = vsel %vm644_vm7, %v790_v21, %v1975_v26  ;;  %v2836_v3 = vsel %vm644_vm7, %v789_v46, %v1974_v44 }
 0x17b   :  { %2232 = vrot.lane.b32.xlu0 %v2176_v30, %s2378_s8  ;;  %2217 = vrot.lane.b32.xlu1 %v2619_v36, %s2371_s0 }
 0x17d   :  { %v1978_v57 = vpop.permute.xlu1 %1977 }
 0x17e   :  { %v1979_v32 = vunpack.i.l.bf16 %v1978_v57 }
 0x17f   :  { %2237 = vrot.lane.b32.xlu0 %v2760_v53, %s2372_s21  ;;  %2227 = vrot.lane.b32.xlu1 %v2632_v58, %s2370_s20 }
 0x183   :  { %2257 = vrot.lane.b32.xlu0 %v2619_v36, %s2374_s23  ;;  %2242 = vrot.lane.b32.xlu1 %v2766_v12, %s2373_s22 }
 0x185   :  { %v2849_v62 = vpop.permute.xlu0 %1987  ;;  %v1983_v1 = vpop.permute.xlu1 %1982 }
 0x186   :  { %v1985_v10 = vunpack.i.h.bf16 %v1983_v1  ;;  %v1984_v5 = vunpack.i.l.bf16 %v1983_v1 }
 0x187   :  { %2267 = vrot.lane.b32.xlu0 %v2176_v30, %s2375_s1  ;;  %2247 = vrot.lane.b32.xlu1 %v2176_v30, %s2377_s28 }
 0x189   :  { %v2853_v2 = vpop.permute.xlu0 %1992 }
 0x18b   :  { %2272 = vrot.lane.b32.xlu0 %v2595_v56, %s2378_s8  ;;  %2252 = vrot.lane.b32.xlu1 %v2579_v42, %s2377_s28 }
 0x18d   :  { %v2859_v36 = vpop.permute.xlu1 %2002  ;;  %v1998_v53 = vpop.permute.xlu0 %1997 }
 0x18e   :  { %v2000_v16 = vunpack.i.h.bf16 %v1998_v53 }
 0x18f   :  { %2262 = vrot.lane.b32.xlu1 %v2632_v58, %s2371_s0 }
 0x191   :  { %v2863_v12 = vpop.permute.xlu1 %2012  ;;  %v2865_v55 = vpop.permute.xlu0 %2007 }
 0x193   :  { %2277 = vrot.lane.b32.xlu1 %v2653_v15, %s2370_s20  ;;  %v1935_v15 = vunpack.i.h.bf16 %v2784_v54 }
 0x195   :  { %v2869_v30 = vpop.permute.xlu0 %2017  ;;  %v2871_v11 = vpop.permute.xlu1 %2027  ;;  %v643_v20 = vsel %vm641_vm6, %v528_v31, %v1935_v15 }
 0x199   :  { %v2873_v56 = vpop.permute.xlu1 %2032  ;;  %v2875_v42 = vpop.permute.xlu0 %2022 }
 0x19a   :  { %v2025_v48 = vunpack.i.h.bf16 %v2875_v42 }
 0x19d   :  { %v2038_v25 = vpop.permute.xlu0 %2037  ;;  %v2048_v26 = vpop.permute.xlu1 %2047 }
 0x19e   :  { %v2040_v44 = vunpack.i.h.bf16 %v2038_v25  ;;  %v2039_v21 = vunpack.i.l.bf16 %v2038_v25  ;;  %v2050_v58 = vunpack.i.h.bf16 %v2048_v26  ;;  %v2049_v46 = vunpack.i.l.bf16 %v2048_v26 }
 0x19f   :  { %v1980_v26 = vunpack.i.h.bf16 %v1978_v57 }
 0x1a0   :  { %v992_v24 = vsel %vm641_vm6, %v542_v22, %v2040_v44  ;;  %v991_v25 = vsel %vm641_vm6, %v541_v19, %v2039_v21  ;;  %v642_v22 = vsel %vm641_vm6, %v527_v0, %v1934_v33  ;;  %v1999_v44 = vunpack.i.l.bf16 %v1998_v53 }
 0x1a1   :  { %v2890_v37 = vsel %vm644_vm7, %v992_v24, %v2050_v58  ;;  %v2893_v23 = vsel %vm644_vm7, %v991_v25, %v2049_v46  ;;  %v2043_v54 = vpop.permute.xlu0 %2042  ;;  %v646_v19 = vsel %vm644_vm7, %v643_v20, %v1945_v35  ;;  %v645_v57 = vsel %vm644_vm7, %v642_v22, %v1944_v41 }
 0x1a2   :  { %v649_v24 = vsel %vm647_vm8, %v646_v19, %v1980_v26  ;;  %v648_v21 = vsel %vm647_vm8, %v645_v57, %v1979_v32 }
 0x1a3   :  { %v652_v46 = vsel %vm650_vm9, %v649_v24, %v1985_v10  ;;  %v651_v1 = vsel %vm650_vm9, %v648_v21, %v1984_v5  ;;  %v2030_v24 = vunpack.i.h.bf16 %v2871_v11  ;;  %v2029_v21 = vunpack.i.l.bf16 %v2871_v11 }
 0x1a4   :  { %v655_v0 = vsel %vm653_vm10, %v652_v46, %v2000_v16  ;;  %v654_v33 = vsel %vm653_vm10, %v651_v1, %v1999_v44  ;;  %v2010_v16 = vunpack.i.h.bf16 %v2865_v55  ;;  %v2009_v44 = vunpack.i.l.bf16 %v2865_v55 }
 0x1a5   :  { %v2053_v58 = vpop.permute.xlu0 %2052  ;;  %v2045_v1 = vunpack.i.h.bf16 %v2043_v54 }
 0x1a6   :  { %v2055_v31 = vunpack.i.h.bf16 %v2053_v58  ;;  %v2054_v15 = vunpack.i.l.bf16 %v2053_v58  ;;  %v793_v8 = vsel %vm647_vm8, %v2836_v3, %v2009_v44  ;;  %v1950_v3 = vunpack.i.h.bf16 %v2796_v28 }
 0x1a8   :  { %v658_v35 = vsel %vm656_vm11, %v655_v0, %v2055_v31  ;;  %v657_v41 = vsel %vm656_vm11, %v654_v33, %v2054_v15  ;;  %v2044_v0 = vunpack.i.l.bf16 %v2043_v54 }
 0x1a9   :  { %v1209_v53 = vpack.c.bf16 %v658_v35, %v657_v41  ;;  %v2907_v25 = vpop.permute.xlu0 %2057 }
 0x1ad   :  { %v2909_v26 = vpop.permute.xlu0 %2067  ;;  %v2063_v32 = vpop.permute.xlu1 %2062 }
 0x1ae   :  { %v2065_v5 = vunpack.i.h.bf16 %v2063_v32  ;;  %v2064_v22 = vunpack.i.l.bf16 %v2063_v32  ;;  %v794_v32 = vsel %vm647_vm8, %v2833_v52, %v2010_v16  ;;  %v1949_v16 = vunpack.i.l.bf16 %v2796_v28 }
 0x1af   :  { %v796_v54 = vsel %vm650_vm9, %v794_v32, %v2030_v24  ;;  %v2070_v43 = vunpack.i.h.bf16 %v2909_v26 }
 0x1b0   :  { %v661_v33 = vsel %vm659_vm5, %v2055_v31, %v2065_v5  ;;  %v660_v35 = vsel %vm659_vm5, %v2054_v15, %v2064_v22  ;;  %v795_v31 = vsel %vm650_vm9, %v793_v8, %v2029_v21  ;;  %v798_v22 = vsel %vm653_vm10, %v796_v54, %v2045_v1 }
 0x1b1   :  { %v2911_v20 = vpop.permute.xlu0 %2077  ;;  %v2913_v10 = vpop.permute.xlu1 %2072  ;;  %v1960_v21 = vunpack.i.h.bf16 %v2802_v40  ;;  %v1990_v1 = vunpack.i.h.bf16 %v2849_v62  ;;  %v719_v28 = vsel %vm641_vm6, %v529_v50, %v1949_v16  ;;  %v2069_v50 = vunpack.i.l.bf16 %v2909_v26 }
 0x1b5   :  { %v2917_v19 = vpop.permute.xlu0 %2082  ;;  %v2088_v57 = vpop.permute.xlu1 %2087 }
 0x1b6   :  { %v2090_v58 = vunpack.i.h.bf16 %v2088_v57  ;;  %v2089_v46 = vunpack.i.l.bf16 %v2088_v57 }
 0x1b8   :  { %v664_v41 = vsel %vm662_vm12, %v661_v33, %v2090_v58  ;;  %v663_v55 = vsel %vm662_vm12, %v660_v35, %v2089_v46  ;;  %v797_v58 = vsel %vm653_vm10, %v795_v31, %v2044_v0  ;;  %v1959_v46 = vunpack.i.l.bf16 %v2802_v40 }
 0x1b9   :  { %v1210_v11 = vpack.c.bf16 %v664_v41, %v663_v55  ;;  %v2929_v63 = vpop.permute.xlu0 %2097  ;;  %v2093_v57 = vpop.permute.xlu1 %2092  ;;  %v1989_v0 = vunpack.i.l.bf16 %v2849_v62  ;;  %v720_v33 = vsel %vm641_vm6, %v530_v51, %v1950_v3  ;;  %v2005_v35 = vunpack.i.h.bf16 %v2859_v36 }
 0x1ba   :  { %v2100_v15 = vunpack.i.h.bf16 %v2929_v63  ;;  %v2099_v5 = vunpack.i.l.bf16 %v2929_v63  ;;  %v2004_v41 = vunpack.i.l.bf16 %v2859_v36  ;;  %v722_v40 = vsel %vm644_vm7, %v720_v33, %v1960_v21 }
 0x1bb   :  { %1724 = vmatprep.mubr.msk.bf16.mxu1 %vm1319_vm13, %v1210_v11  ;;  %v721_v62 = vsel %vm644_vm7, %v719_v28, %v1959_v46  ;;  %v2024_v51 = vunpack.i.l.bf16 %v2875_v42  ;;  %v2095_v11 = vunpack.i.h.bf16 %v2093_v57  ;;  %v2094_v54 = vunpack.i.l.bf16 %v2093_v57 }
 0x1bc   :  { %1384 = vmatmul.mubr.bf16.vlgmr.msra.gmra.mrb[28].mxu1 %v1209_v53  ;;  %v2941_v52 = vsel %vm656_vm11, %v797_v58, %v2099_v5  ;;  %v2946_v8 = vsel %vm656_vm11, %v798_v22, %v2100_v15  ;;  %v724_v36 = vsel %vm647_vm8, %v722_v40, %v1990_v1  ;;  %v723_v31 = vsel %vm647_vm8, %v721_v62, %v1989_v0 }
 0x1bd   :  { %v2950_v44 = vpop.permute.xlu0 %2102  ;;  %v2952_v24 = vpop.permute.xlu1 %2107  ;;  %v1213_v53 = vpack.c.bf16 %v2946_v8, %v2941_v52  ;;  %v726_v22 = vsel %vm650_vm9, %v724_v36, %v2005_v35  ;;  %v725_v58 = vsel %vm650_vm9, %v723_v31, %v2004_v41  ;;  %v732_v26 = vsel %vm659_vm5, %v2070_v43, %v2095_v11 }
 0x1be   :  { %v728_v21 = vsel %vm653_vm10, %v726_v22, %v2025_v48  ;;  %v727_v42 = vsel %vm653_vm10, %v725_v58, %v2024_v51  ;;  %v731_v57 = vsel %vm659_vm5, %v2069_v50, %v2094_v54  ;;  %v1995_v51 = vunpack.i.h.bf16 %v2853_v2 }
 0x1bf   :  { %v729_v1 = vsel %vm656_vm11, %v727_v42, %v2069_v50  ;;  %v730_v0 = vsel %vm656_vm11, %v728_v21, %v2070_v43  ;;  %v1994_v11 = vunpack.i.l.bf16 %v2853_v2  ;;  %v2015_v50 = vunpack.i.h.bf16 %v2863_v12 }
 0x1c0   :  { %v1211_v48 = vpack.c.bf16 %v730_v0, %v729_v1  ;;  %v1925_v36 = vunpack.i.h.bf16 %v2779_v34  ;;  %v1924_v31 = vunpack.i.l.bf16 %v2779_v34  ;;  %v1929_v21 = vunpack.i.l.bf16 %v2786_v61 }
 0x1c1   :  { %v2968_v55 = vpop.permute.xlu0 %2112  ;;  %v2970_v32 = vpop.permute.xlu1 %2117  ;;  %v1940_v42 = vunpack.i.h.bf16 %v2794_v27  ;;  %v860_v2 = vsel %vm641_vm6, %v538_v49, %v1995_v51  ;;  %v2035_v49 = vunpack.i.h.bf16 %v2873_v56 }
 0x1c5   :  { %v2982_v3 = vpop.permute.xlu0 %2132  ;;  %v2123_v16 = vpop.permute.xlu1 %2122 }
 0x1c6   :  { %v2125_v46 = vunpack.i.h.bf16 %v2123_v16  ;;  %v2124_v33 = vunpack.i.l.bf16 %v2123_v16  ;;  %v1930_v16 = vunpack.i.h.bf16 %v2786_v61 }
 0x1c8   :  { %v734_v28 = vsel %vm662_vm12, %v732_v26, %v2125_v46  ;;  %v733_v35 = vsel %vm662_vm12, %v731_v57, %v2124_v33  ;;  %v1939_v46 = vunpack.i.l.bf16 %v2794_v27  ;;  %v859_v33 = vsel %vm641_vm6, %v537_v47, %v1994_v11 }
 0x1c9   :  { %v1212_v41 = vpack.c.bf16 %v734_v28, %v733_v35  ;;  %v2128_v40 = vpop.permute.xlu1 %2127  ;;  %v2992_v62 = vpop.permute.xlu0 %2147  ;;  %v862_v26 = vsel %vm644_vm7, %v860_v2, %v2015_v50  ;;  %v2014_v57 = vunpack.i.l.bf16 %v2863_v12  ;;  %v2020_v28 = vunpack.i.h.bf16 %v2869_v30 }
 0x1ca   :  { %v2130_v22 = vunpack.i.h.bf16 %v2128_v40  ;;  %v2129_v58 = vunpack.i.l.bf16 %v2128_v40  ;;  %v2019_v35 = vunpack.i.l.bf16 %v2869_v30  ;;  %v2034_v40 = vunpack.i.l.bf16 %v2873_v56 }
 0x1cb   :  { %1725 = vmatprep.mubr.msk.bf16.mxu1 %vm1319_vm13, %v1212_v41  ;;  %v2060_v12 = vunpack.i.h.bf16 %v2907_v25  ;;  %v861_v11 = vsel %vm644_vm7, %v859_v33, %v2014_v57  ;;  %v2080_v56 = vunpack.i.h.bf16 %v2911_v20  ;;  %v2079_v50 = vunpack.i.l.bf16 %v2911_v20 }
 0x1cc   :  { %1392 = vmatmul.mubr.bf16.gmra.mrb[32].mxu1 %v1211_v48  ;;  %v802_v38 = vsel %vm659_vm5, %v2100_v15, %v2130_v22  ;;  %v801_v47 = vsel %vm659_vm5, %v2099_v5, %v2129_v58  ;;  %v2059_v48 = vunpack.i.l.bf16 %v2907_v25  ;;  %v926_v5 = vsel %vm641_vm6, %v540_v9, %v2020_v28 }
 0x1cd   :  { %v2998_v54 = vpop.permute.xlu1 %2137  ;;  %v3000_v43 = vpop.permute.xlu0 %2152  ;;  %v3290_v25 = vmax.f32 %v2635_v59, 0.0  ;;  %v2075_v58 = vunpack.i.h.bf16 %v2913_v10  ;;  %v2074_v33 = vunpack.i.l.bf16 %v2913_v10  ;;  %v928_v57 = vsel %vm644_vm7, %v926_v5, %v2035_v49 }
 0x1ce   :  { %v864_v7 = vsel %vm647_vm8, %v862_v26, %v2060_v12  ;;  %v863_v59 = vsel %vm647_vm8, %v861_v11, %v2059_v48  ;;  %v2110_v9 = vunpack.i.h.bf16 %v2952_v24  ;;  %v2109_v28 = vunpack.i.l.bf16 %v2952_v24 }
 0x1cf   :  { %v925_v22 = vsel %vm641_vm6, %v3290_v25, %v2019_v35  ;;  %v930_v10 = vsel %vm647_vm8, %v928_v57, %v2080_v56  ;;  %v865_v24 = vsel %vm650_vm9, %v863_v59, %v2074_v33  ;;  %v2154_v52 = vunpack.i.l.bf16 %v3000_v43 }
 0x1d0   :  { %v927_v20 = vsel %vm644_vm7, %v925_v22, %v2034_v40  ;;  %v866_v40 = vsel %vm650_vm9, %v864_v7, %v2075_v58  ;;  %v2135_v56 = vunpack.i.h.bf16 %v2982_v3 }
 0x1d1   :  { %v2143_v1 = vpop.permute.xlu1 %2142  ;;  %v3016_v0 = vpop.permute.xlu0 %2157  ;;  %v929_v35 = vsel %vm647_vm8, %v927_v20, %v2079_v50  ;;  %v2134_v50 = vunpack.i.l.bf16 %v2982_v3 }
 0x1d2   :  { %v2145_v45 = vunpack.i.h.bf16 %v2143_v1  ;;  %v2144_v41 = vunpack.i.l.bf16 %v2143_v1  ;;  %v2105_v1 = vunpack.i.h.bf16 %v2950_v44  ;;  %v931_v48 = vsel %vm650_vm9, %v929_v35, %v2109_v28 }
 0x1d4   :  { %v804_v30 = vsel %vm662_vm12, %v802_v38, %v2145_v45  ;;  %v803_v51 = vsel %vm662_vm12, %v801_v47, %v2144_v41  ;;  %v2104_v45 = vunpack.i.l.bf16 %v2950_v44  ;;  %v2115_v44 = vunpack.i.h.bf16 %v2968_v55 }
 0x1d5   :  { %v1214_v2 = vpack.c.bf16 %v804_v30, %v803_v51  ;;  %v3035_v15 = vpop.permute.xlu0 %2167  ;;  %v2163_v63 = vpop.permute.xlu1 %2162  ;;  %v2114_v41 = vunpack.i.l.bf16 %v2968_v55  ;;  %v2155_v38 = vunpack.i.h.bf16 %v3000_v43  ;;  %v868_v8 = vsel %vm653_vm10, %v866_v40, %v2105_v1 }
 0x1d6   :  { %v2165_v47 = vunpack.i.h.bf16 %v2163_v63  ;;  %v2164_v12 = vunpack.i.l.bf16 %v2163_v63  ;;  %v932_v55 = vsel %vm650_vm9, %v930_v10, %v2110_v9  ;;  %v2140_v30 = vunpack.i.h.bf16 %v2998_v54 }
 0x1d7   :  { %1726 = vmatprep.mubr.msk.bf16.mxu1 %vm1319_vm13, %v1214_v2  ;;  %v2139_v51 = vunpack.i.l.bf16 %v2998_v54  ;;  %v996_v11 = vsel %vm647_vm8, %v2890_v37, %v2115_v44  ;;  %v995_v43 = vsel %vm647_vm8, %v2893_v23, %v2114_v41  ;;  %v870_v58 = vsel %vm656_vm11, %v868_v8, %v2155_v38 }
 0x1d8   :  { %1400 = vmatmul.mubr.bf16.gmra.mrb[36].mxu1 %v1213_v53  ;;  %v867_v53 = vsel %vm653_vm10, %v865_v24, %v2104_v45  ;;  %v2150_v54 = vunpack.i.h.bf16 %v2992_v62  ;;  %v2149_v37 = vunpack.i.l.bf16 %v2992_v62  ;;  %v872_v33 = vsel %vm659_vm5, %v2155_v38, %v2165_v47 }
 0x1d9   :  { %v3061_v49 = vpop.permute.xlu0 %2192  ;;  %v3063_v26 = vpop.permute.xlu1 %2172  ;;  %v869_v22 = vsel %vm656_vm11, %v867_v53, %v2154_v52  ;;  %v871_v23 = vsel %vm659_vm5, %v2154_v52, %v2164_v12  ;;  %v998_v57 = vsel %vm650_vm9, %v996_v11, %v2140_v30  ;;  %v997_v3 = vsel %vm650_vm9, %v995_v43, %v2139_v51 }
 0x1da   :  { %v2170_v45 = vunpack.i.h.bf16 %v3035_v15  ;;  %v2169_v7 = vunpack.i.l.bf16 %v3035_v15  ;;  %v1215_v62 = vpack.c.bf16 %v870_v58, %v869_v22  ;;  %v934_v40 = vsel %vm653_vm10, %v932_v55, %v2135_v56 }
 0x1db   :  { %v933_v24 = vsel %vm653_vm10, %v931_v48, %v2134_v50  ;;  %v999_v38 = vsel %vm653_vm10, %v997_v3, %v2149_v37  ;;  %v1000_v52 = vsel %vm653_vm10, %v998_v57, %v2150_v54  ;;  %v2085_v22 = vunpack.i.h.bf16 %v2917_v19 }
 0x1dc   :  { %v935_v11 = vsel %vm656_vm11, %v933_v24, %v2169_v7  ;;  %v936_v43 = vsel %vm656_vm11, %v934_v40, %v2170_v45  ;;  %v2084_v58 = vunpack.i.l.bf16 %v2917_v19  ;;  %v2120_v54 = vunpack.i.h.bf16 %v2970_v32 }
 0x1dd   :  { %v3081_v2 = vpop.permute.xlu0 %2202  ;;  %v2178_v63 = vpop.permute.xlu1 %2177  ;;  %v2160_v37 = vunpack.i.h.bf16 %v3016_v0  ;;  %v2175_v57 = vunpack.i.h.bf16 %v3063_v26  ;;  %v3291_v3 = vmax.f32 %v2708_v4, 0.0  ;;  %v2174_v19 = vunpack.i.l.bf16 %v3063_v26 }
 0x1de   :  { %v2180_v5 = vunpack.i.h.bf16 %v2178_v63  ;;  %v2179_v25 = vunpack.i.l.bf16 %v2178_v63  ;;  %v2195_v26 = vunpack.i.h.bf16 %v3061_v49 }
 0x1e0   :  { %v874_v20 = vsel %vm662_vm12, %v872_v33, %v2180_v5  ;;  %v873_v1 = vsel %vm662_vm12, %v871_v23, %v2179_v25  ;;  %v1217_v25 = vpack.c.bf16 %v936_v43, %v935_v11  ;;  %v2159_v23 = vunpack.i.l.bf16 %v3016_v0 }
 0x1e1   :  { %v1216_v59 = vpack.c.bf16 %v874_v20, %v873_v1  ;;  %v2208_v9 = vpop.permute.xlu0 %2207  ;;  %v2183_v28 = vpop.permute.xlu1 %2182  ;;  %v1062_v20 = vsel %vm641_vm6, %v3291_v3, %v2085_v22  ;;  %v3292_v1 = vmax.f32 %v2702_v60, 0.0  ;;  %v3295_v43 = vunpack.i.l.bf16 %v2800_v39 }
 0x1e2   :  { %v2210_v10 = vunpack.i.h.bf16 %v2208_v9  ;;  %v2209_v35 = vunpack.i.l.bf16 %v2208_v9  ;;  %v2185_v44 = vunpack.i.h.bf16 %v2183_v28  ;;  %v2184_v41 = vunpack.i.l.bf16 %v2183_v28 }
 0x1e3   :  { %1727 = vmatprep.mubr.msk.bf16.mxu1 %vm1319_vm13, %v1216_v59  ;;  %v2194_v28 = vunpack.i.l.bf16 %v3061_v49 }
 0x1e4   :  { %v1004_v15 = vsel %vm659_vm5, %v2210_v10, %v1930_v16  ;;  %v1003_v8 = vsel %vm659_vm5, %v2209_v35, %v1929_v21  ;;  %v938_v53 = vsel %vm659_vm5, %v2170_v45, %v2185_v44  ;;  %v937_v47 = vsel %vm659_vm5, %v2169_v7, %v2184_v41  ;;  %1408 = vmatmul.mubr.bf16.gmra.mrb[40].mxu1 %v1215_v62 }
 0x1e5   :  { %v3108_v12 = vpop.permute.xlu0 %2212  ;;  %v2188_v55 = vpop.permute.xlu1 %2187  ;;  %v939_v48 = vsel %vm662_vm12, %v937_v47, %v1924_v31  ;;  %v940_v16 = vsel %vm662_vm12, %v938_v53, %v1925_v36  ;;  %v1005_v61 = vsel %vm662_vm12, %v1003_v8, %v1939_v46  ;;  %v1006_v21 = vsel %vm662_vm12, %v1004_v15, %v1940_v42 }
 0x1e6   :  { %v2190_v30 = vunpack.i.h.bf16 %v2188_v55  ;;  %v2189_v51 = vunpack.i.l.bf16 %v2188_v55  ;;  %v1218_v56 = vpack.c.bf16 %v940_v16, %v939_v48  ;;  %v1220_v31 = vpack.c.bf16 %v1006_v21, %v1005_v61 }
 0x1e7   :  { %v1001_v34 = vsel %vm656_vm11, %v999_v38, %v2209_v35  ;;  %v1002_v36 = vsel %vm656_vm11, %v1000_v52, %v2210_v10  ;;  %v1064_v45 = vsel %vm644_vm7, %v1062_v20, %v2120_v54  ;;  %v3293_v53 = vmax.f32 %v2723_v13, 0.0 }
 0x1e8   :  { %v1076_v50 = vsel %vm662_vm12, %v2815_v14, %v2190_v30  ;;  %v1075_v27 = vsel %vm662_vm12, %v2820_v17, %v2189_v51  ;;  %v1219_v46 = vpack.c.bf16 %v1002_v36, %v1001_v34  ;;  %1728 = vmatprep.mubr.msk.bf16.mxu1 %vm1319_vm13, %v1218_v56  ;;  %v2119_v14 = vunpack.i.l.bf16 %v2970_v32 }
 0x1e9   :  { %v1222_v42 = vpack.c.bf16 %v1076_v50, %v1075_v27  ;;  %v3131_v63 = vpop.permute.xlu0 %2222  ;;  %v2198_v5 = vpop.permute.xlu1 %2197  ;;  %v1061_v32 = vsel %vm641_vm6, %v3292_v1, %v2084_v58  ;;  %v1066_v0 = vsel %vm647_vm8, %v1064_v45, %v2160_v37  ;;  %v1127_v47 = vsel %vm641_vm6, %v3293_v53, %v2194_v28 }
 0x1ea   :  { %v1063_v9 = vsel %vm644_vm7, %v1061_v32, %v2119_v14  ;;  %v1068_v60 = vsel %vm650_vm9, %v1066_v0, %v2175_v57  ;;  %v2199_v35 = vunpack.i.l.bf16 %v2198_v5  ;;  %v2200_v41 = vunpack.i.h.bf16 %v2198_v5 }
 0x1eb   :  { %v1065_v10 = vsel %vm647_vm8, %v1063_v9, %v2159_v23  ;;  %v2215_v49 = vunpack.i.h.bf16 %v3108_v12  ;;  %v2214_v55 = vunpack.i.l.bf16 %v3108_v12  ;;  %v3294_v61 = vmax.f32 %v2728_v18, 0.0 }
 0x1ec   :  { %1416 = vmatmul.mubr.bf16.gmra.mrb[44].mxu1 %v1217_v25  ;;  %v1067_v44 = vsel %vm650_vm9, %v1065_v10, %v2174_v19  ;;  %v2204_v30 = vunpack.i.l.bf16 %v3081_v2  ;;  %v1129_v51 = vsel %vm644_vm7, %v1127_v47, %v2199_v35  ;;  %v3296_v56 = vunpack.i.h.bf16 %v2800_v39 }
 0x1ed   :  { %v2233_v17 = vpop.permute.xlu0 %2232  ;;  %v2218_v33 = vpop.permute.xlu1 %2217  ;;  %1729 = vmatprep.mubr.msk.bf16.mxu1 %vm1319_vm13, %v1220_v31  ;;  %v1128_v21 = vsel %vm641_vm6, %v3294_v61, %v2195_v26  ;;  %v2205_v18 = vunpack.i.h.bf16 %v3081_v2  ;;  %v2225_v27 = vunpack.i.h.bf16 %v3131_v63  ;;  %v3297_v45 = vmax.f32 %v2746_v6, 0.0 }
 0x1ee   :  { %v2235_v7 = vunpack.i.h.bf16 %v2233_v17  ;;  %v2234_v59 = vunpack.i.l.bf16 %v2233_v17  ;;  %v2220_v40 = vunpack.i.h.bf16 %v2218_v33  ;;  %v2219_v24 = vunpack.i.l.bf16 %v2218_v33 }
 0x1ef   :  { %v1130_v34 = vsel %vm644_vm7, %v1128_v21, %v2200_v41  ;;  %v1131_v22 = vsel %vm647_vm8, %v1129_v51, %v2204_v30 }
 0x1f0   :  { %v1070_v38 = vsel %vm653_vm10, %v1068_v60, %v2235_v7  ;;  %v1069_v52 = vsel %vm653_vm10, %v1067_v44, %v2234_v59  ;;  %v1140_v13 = vsel %vm659_vm5, %v2215_v49, %v2220_v40  ;;  %v1139_v11 = vsel %vm659_vm5, %v2214_v55, %v2219_v24 }
 0x1f1   :  { %v2238_v62 = vpop.permute.xlu0 %2237  ;;  %v2228_v4 = vpop.permute.xlu1 %2227  ;;  %v1071_v12 = vsel %vm656_vm11, %v1069_v52, %v3295_v43  ;;  %v1072_v31 = vsel %vm656_vm11, %v1070_v38, %v3296_v56  ;;  %v1132_v33 = vsel %vm647_vm8, %v1130_v34, %v2205_v18  ;;  %v3298_v59 = vmax.f32 %v2743_v29, 0.0  ;;  %v2360_v56 = vld [vmem:[%s3276_s3] sm:$0xff]  }
 0x1f2   :  { %v2230_v15 = vunpack.i.h.bf16 %v2228_v4  ;;  %v2229_v8 = vunpack.i.l.bf16 %v2228_v4  ;;  %v2239_v39 = vunpack.i.l.bf16 %v2238_v62  ;;  %v1221_v14 = vpack.c.bf16 %v1072_v31, %v1071_v12  ;;  %1882 = vmatpush3.bf16.msra.mxu1 %v2360_v56 }
 0x1f4   :  { %1424 = vmatmul.mubr.bf16.gmra.mrb[48].mxu1 %v1219_v46  ;;  %v1141_v36 = vsel %vm662_vm12, %v1139_v11, %v2229_v8  ;;  %v1142_v50 = vsel %vm662_vm12, %v1140_v13, %v2230_v15  ;;  %v2224_v46 = vunpack.i.l.bf16 %v3131_v63  ;;  %v1193_v9 = vsel %vm641_vm6, %v3298_v59, %v2239_v39 }
 0x1f5   :  { %v3163_v48 = vpop.permute.xlu0 %2257  ;;  %v2243_v16 = vpop.permute.xlu1 %2242  ;;  %1730 = vmatprep.mubr.msk.bf16.mxu1 %vm1319_vm13, %v1222_v42  ;;  %v2240_v42 = vunpack.i.h.bf16 %v2238_v62  ;;  %v1224_v2 = vpack.c.bf16 %v1142_v50, %v1141_v36  ;;  %v2361_v50 = vld [vmem:[%s3276_s3 + $0x8] sm:$0xff]  }
 0x1f6   :  { %v2245_v37 = vunpack.i.h.bf16 %v2243_v16  ;;  %v2244_v17 = vunpack.i.l.bf16 %v2243_v16  ;;  %v2260_v53 = vunpack.i.h.bf16 %v3163_v48  ;;  %v2259_v47 = vunpack.i.l.bf16 %v3163_v48 }
 0x1f7   :  { %v1194_v7 = vsel %vm641_vm6, %v3297_v45, %v2240_v42  ;;  %v3299_v48 = vmov 0.0  }
 0x1f8   :  { %v1196_v62 = vsel %vm644_vm7, %v1194_v7, %v2245_v37  ;;  %v1195_v4 = vsel %vm644_vm7, %v1193_v9, %v2244_v17  ;;  %1883 = vmatprep.subr.bf16.mxu1 %v3299_v48  ;;  %v2363_v37 = vld [vmem:[%s3276_s3 + $0x18] sm:$0xff]  }
 0x1f9   :  { %v2268_v5 = vpop.permute.xlu0 %2267  ;;  %v2248_v25 = vpop.permute.xlu1 %2247  ;;  %1884 = vmatpush3.bf16.msra.mxu1 %v2361_v50 }
 0x1fa   :  { %v2250_v58 = vunpack.i.h.bf16 %v2248_v25  ;;  %v2249_v54 = vunpack.i.l.bf16 %v2248_v25  ;;  %v2270_v23 = vunpack.i.h.bf16 %v2268_v5  ;;  %v2269_v57 = vunpack.i.l.bf16 %v2268_v5  ;;  %1885 = vmatprep.subr.bf16.mxu1 %v3299_v48 }
 0x1fc   :  { %v1133_v3 = vsel %vm650_vm9, %v1131_v22, %v2249_v54  ;;  %v1134_v63 = vsel %vm650_vm9, %v1132_v33, %v2250_v58  ;;  %1432 = vmatmul.mubr.bf16.gmra.mrb[52].mxu1 %v1221_v14  ;;  %v1197_v60 = vsel %vm647_vm8, %v1195_v4, %v2269_v57  ;;  %v1198_v6 = vsel %vm647_vm8, %v1196_v62, %v2270_v23  ;;  %v2362_v22 = vld [vmem:[%s3276_s3 + $0x10] sm:$0xff]   ;;  %v2364_v57 = vld [vmem:[%s3276_s3 + $0x20] sm:$0xff]  }
 0x1fd   :  { %v2273_v20 = vpop.permute.xlu0 %2272  ;;  %v2253_v19 = vpop.permute.xlu1 %2252  ;;  %1731 = vmatprep.mubr.msk.bf16.mxu1 %vm1319_vm13, %v1224_v2  ;;  %v1135_v1 = vsel %vm653_vm10, %v1133_v3, %v2224_v46  ;;  %v1136_v32 = vsel %vm653_vm10, %v1134_v63, %v2225_v27  ;;  %1886 = vmatpush3.bf16.msra.mxu1 %v2362_v22 }
 0x1fe   :  { %v2255_v0 = vunpack.i.h.bf16 %v2253_v19  ;;  %v2254_v28 = vunpack.i.l.bf16 %v2253_v19  ;;  %v1137_v10 = vsel %vm656_vm11, %v1135_v1, %v2214_v55  ;;  %v1138_v26 = vsel %vm656_vm11, %v1136_v32, %v2215_v49  ;;  %1887 = vmatprep.subr.bf16.mxu1 %v3299_v48 }
 0x1ff   :  { %v2275_v35 = vunpack.i.h.bf16 %v2273_v20  ;;  %v2274_v44 = vunpack.i.l.bf16 %v2273_v20  ;;  %v1223_v24 = vpack.c.bf16 %v1138_v26, %v1137_v10 }
 0x200   :  { %v1199_v29 = vsel %vm650_vm9, %v1197_v60, %v2254_v28  ;;  %v1200_v41 = vsel %vm650_vm9, %v1198_v6, %v2255_v0  ;;  %v2365_v0 = vld [vmem:[%s3276_s3 + $0x28] sm:$0xff]   ;;  %v2366_v60 = vld [vmem:[%s3276_s3 + $0x30] sm:$0x3f]   ;;  %s2384_s3 = smov 96  }
 0x201   :  { %v2263_v40 = vpop.permute.xlu1 %2262  ;;  %v1201_v15 = vsel %vm653_vm10, %v1199_v29, %v2274_v44  ;;  %v1202_v8 = vsel %vm653_vm10, %v1200_v41, %v2275_v35  ;;  %1888 = vmatpush3.bf16.msra.mxu1 %v2363_v37  ;;  %v1611_v44 = vsel %vm1609_vm14, %v2366_v60, 0 }
 0x202   :  { %v2265_v38 = vunpack.i.h.bf16 %v2263_v40  ;;  %v2264_v52 = vunpack.i.l.bf16 %v2263_v40  ;;  %v1203_v30 = vsel %vm656_vm11, %v1201_v15, %v2259_v47  ;;  %v1204_v51 = vsel %vm656_vm11, %v1202_v8, %v2260_v53  ;;  %1889 = vmatprep.subr.bf16.mxu1 %v3299_v48 }
 0x203   :  { %v1225_v12 = vpack.c.bf16 %v1204_v51, %v1203_v30 }
 0x204   :  { %1440 = vmatmul.mubr.bf16.gmra.mrb[56].mxu1 %v1223_v24  ;;  %v1206_v61 = vsel %vm659_vm5, %v2260_v53, %v2265_v38  ;;  %v1205_v21 = vsel %vm659_vm5, %v2259_v47, %v2264_v52 }
 0x205   :  { %v2278_v49 = vpop.permute.xlu1 %2277  ;;  %1890 = vmatpush3.bf16.msra.mxu1 %v2364_v57 }
 0x206   :  { %v2280_v55 = vunpack.i.h.bf16 %v2278_v49  ;;  %v2279_v16 = vunpack.i.l.bf16 %v2278_v49  ;;  %1891 = vmatprep.subr.bf16.mxu1 %v3299_v48 }
 0x208   :  { %v1207_v13 = vsel %vm662_vm12, %v1205_v21, %v2279_v16  ;;  %v1208_v11 = vsel %vm662_vm12, %v1206_v61, %v2280_v55 }
 0x209   :  { %v1226_v43 = vpack.c.bf16 %v1208_v11, %v1207_v13  ;;  %1892 = vmatpush3.bf16.msra.mxu1 %v2365_v0 }
 0x20a   :  { %1893 = vmatprep.subr.bf16.mxu1 %v3299_v48 }
 0x20b   :  { %1732 = vmatprep.mubr.msk.bf16.mxu1 %vm1319_vm13, %v1226_v43 }
 0x20c   :  { %1448 = vmatmul.mubr.bf16.gmra.mrb[60].mxu1 %v1225_v12 }
 0x20d   :  { %1895 = vmatprep.mubr.msk.bf16.mxu1 %vm2369_vm2, %v3299_v48  ;;  %1894 = vmatpush3.bf16.msra.mxu1 %v1611_v44  ;;  %vm1533_vm2 = vcmask 588800  }
 0x28f   :  { %v3223_v31 = vpop.f32.mrb[28].mxu1 }
 0x290   :  { %v1387_v18 = vpop.f32.mrb[29].mxu1 }
 0x291   :  { %v3225_v34 = vpop.f32.mrb[30].mxu1 }
 0x292   :  { %v1390_v36 = vpop.f32.mrb[31].mxu1 }
 0x29f   :  { %v1393_v27 = vpop.f32.mrb[32].mxu1 }
 0x2a0   :  { %v1395_v46 = vpop.f32.mrb[33].mxu1 }
 0x2a1   :  { %v1396_v42 = vpop.f32.mrb[34].mxu1 }
 0x2a2   :  { %v2281_v5 = vpack.i.bf16 %v1396_v42, %v1393_v27  ;;  %v1398_v25 = vpop.f32.mrb[35].mxu1 }
 0x2a4   :  { %2282 = vrot.lane.b32.xlu0 %v2281_v5, %s2371_s0 }
 0x2ab   :  { %v1401_v39 = vpop.f32.mrb[36].mxu1 }
 0x2ac   :  { %v1403_v58 = vpop.f32.mrb[37].mxu1 }
 0x2ad   :  { %v1404_v54 = vpop.f32.mrb[38].mxu1 }
 0x2ae   :  { %v2286_v14 = vpack.i.bf16 %v1404_v54, %v1401_v39  ;;  %v1406_v2 = vpop.f32.mrb[39].mxu1 }
 0x2b0   :  { %2287 = vrot.lane.b32.xlu1 %v2286_v14, %s2379_s30 }
 0x2b7   :  { %v1409_v17 = vpop.f32.mrb[40].mxu1 }
 0x2b8   :  { %v1411_v33 = vpop.f32.mrb[41].mxu1 }
 0x2b9   :  { %v1412_v23 = vpop.f32.mrb[42].mxu1 }
 0x2ba   :  { %v2291_v3 = vpack.i.bf16 %v1412_v23, %v1409_v17  ;;  %v1414_v63 = vpop.f32.mrb[43].mxu1 }
 0x2bc   :  { %2292 = vrot.lane.b32.xlu0 %v2291_v3, %s2380_s9 }
 0x2bf   :  { %v1417_v20 = vpop.f32.mrb[44].mxu1 }
 0x2c0   :  { %v1419_v19 = vpop.f32.mrb[45].mxu1 }
 0x2c1   :  { %v1420_v1 = vpop.f32.mrb[46].mxu1 }
 0x2c2   :  { %v2296_v32 = vpack.i.bf16 %v1420_v1, %v1417_v20  ;;  %v1422_v45 = vpop.f32.mrb[47].mxu1 }
 0x2c4   :  { %2297 = vrot.lane.b32.xlu1 %v2296_v32, %s2381_s10 }
 0x2c7   :  { %v1425_v7 = vpop.f32.mrb[48].mxu1 }
 0x2c8   :  { %v1427_v59 = vpop.f32.mrb[49].mxu1 }
 0x2c9   :  { %v1428_v9 = vpop.f32.mrb[50].mxu1 }
 0x2ca   :  { %v2301_v28 = vpack.i.bf16 %v1428_v9, %v1425_v7  ;;  %v1430_v62 = vpop.f32.mrb[51].mxu1  ;;  %v1733_v7 = vld [vmem:[%s3277_s4] ss:$0 sm:$0xff] }
 0x2cc   :  { %2302 = vrot.lane.b32.xlu0 %v2301_v28, %s2375_s1  ;;  %s2383_s1 = smov 84  }
 0x2cf   :  { %v1433_v4 = vpop.f32.mrb[52].mxu1 }
 0x2d0   :  { %v1435_v10 = vpop.f32.mrb[53].mxu1 }
 0x2d1   :  { %v1436_v26 = vpop.f32.mrb[54].mxu1 }
 0x2d2   :  { %v2306_v6 = vpack.i.bf16 %v1436_v26, %v1433_v4  ;;  %v1438_v35 = vpop.f32.mrb[55].mxu1 }
 0x2d4   :  { %2307 = vrot.lane.b32.xlu1 %v2306_v6, %s2382_s15 }
 0x2d7   :  { %v1441_v29 = vpop.f32.mrb[56].mxu1 }
 0x2d8   :  { %v1443_v41 = vpop.f32.mrb[57].mxu1 }
 0x2d9   :  { %v1444_v40 = vpop.f32.mrb[58].mxu1 }
 0x2da   :  { %v2311_v24 = vpack.i.bf16 %v1444_v40, %v1441_v29  ;;  %v1446_v38 = vpop.f32.mrb[59].mxu1 }
 0x2dc   :  { %2312 = vrot.lane.b32.xlu0 %v2311_v24, %s2383_s1 }
 0x2df   :  { %v1449_v52 = vpop.f32.mrb[60].mxu1 }
 0x2e0   :  { %v1451_v15 = vpop.f32.mrb[61].mxu1 }
 0x2e1   :  { %v1452_v8 = vpop.f32.mrb[62].mxu1 }
 0x2e2   :  { %v2316_v53 = vpack.i.bf16 %v1452_v8, %v1449_v52  ;;  %v1454_v47 = vpop.f32.mrb[63].mxu1 }
 0x2e4   :  { %2317 = vrot.lane.b32.xlu1 %v2316_v53, %s2384_s3 }
 0x316   :  { %v2283_v49 = vpop.permute.xlu0 %2282 }
 0x317   :  { %v2285_v30 = vunpack.i.h.bf16 %v2283_v49  ;;  %v2284_v51 = vunpack.i.l.bf16 %v2283_v49 }
 0x319   :  { %v1521_v50 = vsel %vm659_vm5, %v3225_v34, %v2285_v30  ;;  %v1520_v27 = vsel %vm659_vm5, %v3223_v31, %v2284_v51  ;;  %vm1605_vm5 = vcmask 883712  }
 0x322   :  { %v2288_v55 = vpop.permute.xlu1 %2287 }
 0x323   :  { %v2290_v13 = vunpack.i.h.bf16 %v2288_v55  ;;  %v2289_v11 = vunpack.i.l.bf16 %v2288_v55 }
 0x325   :  { %v1524_v5 = vsel %vm1522_vm15, %v1521_v50, %v2290_v13  ;;  %v1523_v25 = vsel %vm1522_vm15, %v1520_v27, %v2289_v11 }
 0x32e   :  { %v2293_v16 = vpop.permute.xlu0 %2292 }
 0x32f   :  { %v2295_v43 = vunpack.i.h.bf16 %v2293_v16  ;;  %v2294_v12 = vunpack.i.l.bf16 %v2293_v16 }
 0x331   :  { %v1527_v58 = vsel %vm1525_vm0, %v1524_v5, %v2295_v43  ;;  %v1526_v54 = vsel %vm1525_vm0, %v1523_v25, %v2294_v12 }
 0x336   :  { %v2298_v61 = vpop.permute.xlu1 %2297 }
 0x337   :  { %v2300_v56 = vunpack.i.h.bf16 %v2298_v61  ;;  %v2299_v18 = vunpack.i.l.bf16 %v2298_v61 }
 0x339   :  { %v1530_v37 = vsel %vm1528_vm1, %v1527_v58, %v2300_v56  ;;  %v1529_v17 = vsel %vm1528_vm1, %v1526_v54, %v2299_v18 }
 0x33e   :  { %v2303_v21 = vpop.permute.xlu0 %2302 }
 0x33f   :  { %v2305_v46 = vunpack.i.h.bf16 %v2303_v21  ;;  %v2304_v42 = vunpack.i.l.bf16 %v2303_v21 }
 0x341   :  { %v1532_v34 = vsel %vm647_vm8, %v1530_v37, %v2305_v46  ;;  %v1531_v31 = vsel %vm647_vm8, %v1529_v17, %v2304_v42 }
 0x346   :  { %v2308_v48 = vpop.permute.xlu1 %2307 }
 0x347   :  { %v2310_v22 = vunpack.i.h.bf16 %v2308_v48  ;;  %v2309_v39 = vunpack.i.l.bf16 %v2308_v48 }
 0x349   :  { %v1535_v23 = vsel %vm1533_vm2, %v1532_v34, %v2310_v22  ;;  %v1534_v57 = vsel %vm1533_vm2, %v1531_v31, %v2309_v39 }
 0x34e   :  { %v2313_v36 = vpop.permute.xlu0 %2312 }
 0x34f   :  { %v2315_v14 = vunpack.i.h.bf16 %v2313_v36  ;;  %v2314_v2 = vunpack.i.l.bf16 %v2313_v36 }
 0x351   :  { %v1538_v20 = vsel %vm1536_vm3, %v1535_v23, %v2315_v14  ;;  %v1537_v19 = vsel %vm1536_vm3, %v1534_v57, %v2314_v2 }
 0x356   :  { %v2318_v33 = vpop.permute.xlu1 %2317 }
 0x357   :  { %v2320_v3 = vunpack.i.h.bf16 %v2318_v33  ;;  %v2319_v63 = vunpack.i.l.bf16 %v2318_v33 }
 0x359   :  { %v1541_v1 = vsel %vm1539_vm4, %v1538_v20, %v2320_v3  ;;  %v1540_v32 = vsel %vm1539_vm4, %v1537_v19, %v2319_v63 }
 0x35a   :  { %v1542_v45 = vpack.c.bf16 %v1541_v1, %v1540_v32 }
 0x35c   :  { %1896 = vmatmul.mubr.msk.bf16.vlgmr.msra.gmra.mrb[64].mxu1 %vm1605_vm5, %v1542_v45 }
 0x42f   :  { %v1647_v59 = vpop.f32.mrb[64].mxu1 }
 0x430   :  { %v1648_v9 = vadd.f32 %v1733_v7, %v1647_v59  ;;  %v1897_v0 = vpop.f32.mrb[65].mxu1 }
 0x431   :  { %v1650_v28 = vpop.f32.mrb[66].mxu1 }
 0x432   :  { %1654 = vst [vmem:[%s3278_s5] sm:$0xff] %v1648_v9  ;;  %v1651_v62 = vadd.f32 %v1733_v7, %v1650_v28  ;;  %v1898_v4 = vpop.f32.mrb[67].mxu1 }
 0x434   :  { %1655 = vst [vmem:[%s3278_s5 + $0x8] sm:$0xff] %v1651_v62 }

</bundles_post_ra>
